<compile_context>
chip_gen: v7x
topology: tpu7x:2x2x1
jax: 0.10.0
libtpu: 0.0.40
codegen_flags: <defaults>
</compile_context>

<pallas_src>
import functools

import jax
import jax.numpy as jnp
from jax import lax
from jax.experimental import pallas as pl
from jax.experimental.pallas import tpu as pltpu

H = 128          # LSTM hidden size (fixed by the module)
H2 = 64          # fc2 logical output size
H2P = 128        # fc2 padded (lane-dense) width
OUT_PAD = 128    # lane-dense padded output width (>= m_control)
GATES = 4 * H    # 512


def _gamma_lstm_kernel(
    x_ref,      # (tile_b, Dp)   flattened [state | u] rows, zero-padded K
    wih_ref,    # (Dp, 4H)       input->hidden weights (g-gate cols pre-scaled x2)
    whh_ref,    # (H, 4H)        hidden->hidden weights (g-gate cols pre-scaled x2)
    b_ref,      # (1, 4H)        b_ih + b_hh (g-gate cols pre-scaled x2)
    w2_ref,     # (H, H2P)
    b2_ref,     # (1, H2P)
    w3_ref,     # (H2P, OUT_PAD) zero-padded beyond m_control
    b3_ref,     # (1, OUT_PAD)
    out_ref,    # (tile_b, OUT_PAD)
    h_ref,      # scratch (1, H)   carried LSTM hidden state (across grid steps)
    c_ref,      # scratch (1, H)   carried LSTM cell state
    gates_ref,  # scratch (tile_b, 4H)
    hseq_ref,   # scratch (tile_b, H)
    *,
    unroll,
):
    tile_b = x_ref.shape[0]

    # The recurrence runs over the whole batch ("sequence"): reset the carried
    # state only on the first grid step.
    @pl.when(pl.program_id(0) == 0)
    def _():
        h_ref[...] = jnp.zeros_like(h_ref)
        c_ref[...] = jnp.zeros_like(c_ref)

    # Input->gates for every row of the tile in one MXU matmul.
    gates_ref[...] = (
        jnp.dot(x_ref[...], wih_ref[...], preferred_element_type=jnp.float32)
        + b_ref[...]
    )

    # Sequential LSTM recurrence over the rows of this tile.  h/c are carried
    # as values (vregs) — no per-row VMEM round-trip on the critical path.
    def step(t, carry):
        h, c = carry                                              # (1, H) each
        g = gates_ref[pl.ds(t, 1), :] + jnp.dot(
            h, whh_ref[...], preferred_element_type=jnp.float32)  # (1, 4H)
        # One EUP pass over the whole row; g-gate columns were pre-scaled x2 in
        # the wrapper, so tanh(z) = 2*sigmoid(2z) - 1 is recovered on the VPU.
        s = jax.nn.sigmoid(g)
        i_g = s[:, 0 * H:1 * H]
        f_g = s[:, 1 * H:2 * H]
        g_g = 2.0 * s[:, 2 * H:3 * H] - 1.0
        o_g = s[:, 3 * H:4 * H]
        c_new = f_g * c + i_g * g_g
        h_new = o_g * jnp.tanh(c_new)
        hseq_ref[pl.ds(t, 1), :] = jnp.maximum(h_new, 0.0)        # fused ReLU
        return (h_new, c_new)

    h_fin, c_fin = lax.fori_loop(
        0, tile_b, step, (h_ref[...], c_ref[...]), unroll=unroll)

    # Write the carry back once so it persists into the next grid step.
    h_ref[...] = h_fin
    c_ref[...] = c_fin

    # Head MLP — batched over the whole tile, lane-dense (padded) slabs.
    x2 = jnp.maximum(
        jnp.dot(hseq_ref[...], w2_ref[...], preferred_element_type=jnp.float32)
        + b2_ref[...],
        0.0,
    )
    out_ref[...] = jnp.tanh(
        jnp.dot(x2, w3_ref[...], preferred_element_type=jnp.float32) + b3_ref[...]
    )


def gamma_linear_lstm(state, u, params, *, tile_b_max=256, unroll=8):
    """Fused forward pass of Gamma_linear_LSTM_old.

    state:  (bs, traj_len, n_state)   float32
    u:      (bs, traj_len, m_control) float32
    params: dict with pre-transposed weights (see init_params)
    returns (bs, m_control) float32
    """
    # TODO(synk): preprocess_func is assumed None (the module's default); a
    # user-supplied runtime callable has no generic Pallas equivalent here.
    bs, traj_len, n_state = state.shape
    m_control = u.shape[2]
    d = traj_len * (n_state + m_control)

    # concat + flatten (pure layout work, done wrapper-side).
    x = jnp.concatenate([state, u], axis=-1).reshape(bs, d).astype(jnp.float32)

    # Pad K to a multiple of 128 so the first matmul and input DMAs are aligned.
    dp = max(128, pl.cdiv(d, 128) * 128)
    x = jnp.pad(x, ((0, 0), (0, dp - d)))

    # Pre-scale the g-gate (cell-candidate) columns by 2 so the kernel can use
    # a single sigmoid over the full 4H gate row (tanh(z) = 2*sigmoid(2z) - 1).
    gscale = jnp.concatenate([
        jnp.ones((2 * H,), jnp.float32),
        jnp.full((H,), 2.0, jnp.float32),
        jnp.ones((H,), jnp.float32),
    ])
    wih = jnp.pad(params["w_ih"], ((0, dp - d), (0, 0))) * gscale
    whh = params["w_hh"] * gscale
    b = params["b"] * gscale

    # Lane-dense head: pad fc2 64 -> 128 lanes and fc3 to OUT_PAD columns
    # (zero padding, mathematically inert).
    w2 = jnp.pad(params["w2"], ((0, 0), (0, H2P - H2)))
    b2 = jnp.pad(params["b2"], ((0, 0), (0, H2P - H2)))
    w3 = jnp.pad(params["w3"], ((0, H2P - H2), (0, OUT_PAD - m_control)))
    b3 = jnp.pad(params["b3"], ((0, 0), (0, OUT_PAD - m_control)))

    def round_up(a, m):
        return ((a + m - 1) // m) * m

    unroll = max(1, int(unroll))
    tile_b_max = max(unroll, round_up(int(tile_b_max), unroll))

    # VMEM-aware tile_b cap (portable across v5e/v6e/v7x).  Weights are
    # conservatively assumed double-buffered even though constant index_maps
    # DMA them only once.
    weight_bytes = 4 * (dp * GATES + H * GATES + GATES
                        + H * H2P + H2P + H2P * OUT_PAD + OUT_PAD)
    fixed_bytes = 2 * weight_bytes + 4 * 2 * H            # weights + h/c scratch
    per_row_bytes = 4 * (2 * dp + 2 * OUT_PAD + GATES + H)  # x(x2)+out(x2)+gates+hseq
    budget = 40 * 1024 * 1024
    avail = max(budget - fixed_bytes, per_row_bytes * unroll)
    tile_b_cap = max(unroll, (avail // per_row_bytes) // unroll * unroll)
    tile_b_max = min(tile_b_max, int(tile_b_cap))

    # Batch tiling (padded rows come AFTER the real rows, so the recurrence
    # over them cannot affect real outputs).  tile_b is a multiple of unroll.
    if bs <= tile_b_max:
        tile_b = round_up(bs, unroll)
    else:
        tile_b = tile_b_max
    padded_bs = round_up(bs, tile_b)
    if padded_bs != bs:
        x = jnp.pad(x, ((0, padded_bs - bs), (0, 0)))
    grid = (padded_bs // tile_b,)

    est_bytes = fixed_bytes + per_row_bytes * tile_b + (1 << 20)
    vmem_limit = int(min(max(2 * est_bytes, 32 * 1024 * 1024), 100 * 1024 * 1024))

    row_spec = pl.BlockSpec((tile_b, dp), lambda i: (i, 0))
    out_spec = pl.BlockSpec((tile_b, OUT_PAD), lambda i: (i, 0))

    def w_spec(r, c):  # weights stay VMEM-resident across grid steps
        return pl.BlockSpec((r, c), lambda i: (0, 0))

    flops = 2 * padded_bs * (dp * GATES + H * GATES + H * H2P + H2P * OUT_PAD)
    transcendentals = padded_bs * (GATES + H + OUT_PAD)  # gate sigmoid + tanh(c) + head
    bytes_accessed = 4 * padded_bs * (dp + OUT_PAD) + weight_bytes

    kernel = functools.partial(_gamma_lstm_kernel, unroll=unroll)

    out = pl.pallas_call(
        kernel,
        out_shape=jax.ShapeDtypeStruct((padded_bs, OUT_PAD), jnp.float32),
        grid=grid,
        in_specs=[
            row_spec,
            w_spec(dp, GATES),
            w_spec(H, GATES),
            w_spec(1, GATES),
            w_spec(H, H2P),
            w_spec(1, H2P),
            w_spec(H2P, OUT_PAD),
            w_spec(1, OUT_PAD),
        ],
        out_specs=out_spec,
        scratch_shapes=[
            pltpu.VMEM((1, H), jnp.float32),            # h carry
            pltpu.VMEM((1, H), jnp.float32),            # c carry
            pltpu.VMEM((tile_b, GATES), jnp.float32),   # pre-gates
            pltpu.VMEM((tile_b, H), jnp.float32),       # relu(h) sequence
        ],
        compiler_params=pltpu.CompilerParams(
            # h/c carry across batch tiles: the grid axis must stay sequential.
            dimension_semantics=("arbitrary",),
            vmem_limit_bytes=vmem_limit,
        ),
        cost_estimate=pl.CostEstimate(
            flops=flops,
            transcendentals=transcendentals,
            bytes_accessed=bytes_accessed,
        ),
    )(x, wih, whh, b, w2, b2, w3, b3)

    return out[:bs, :m_control]


def init_params(key, n_state, m_control, traj_len):
    """Deterministic synthetic init (uniform, PyTorch-like 1/sqrt(fan) bounds).
    LSTM weights are stored pre-transposed as (in, 4H)/(H, 4H), gate order
    [i, f, g, o]; the two LSTM biases are pre-summed into one (1, 4H) vector."""
    d = traj_len * (n_state + m_control)

    def uniform(k, shape, fan):
        bound = 1.0 / jnp.sqrt(jnp.float32(fan))
        return jax.random.uniform(k, shape, jnp.float32, -bound, bound)

    ks = jax.random.split(key, 8)
    w_ih = uniform(ks[0], (d, 4 * H), H)
    w_hh = uniform(ks[1], (H, 4 * H), H)
    b = uniform(ks[2], (1, 4 * H), H) + uniform(ks[3], (1, 4 * H), H)
    w2 = uniform(ks[4], (H, H2), H)
    b2 = uniform(ks[5], (1, H2), H)
    w3 = uniform(ks[6], (H2, m_control), H2)
    b3 = uniform(ks[7], (1, m_control), H2)
    return {"w_ih": w_ih, "w_hh": w_hh, "b": b,
            "w2": w2, "b2": b2, "w3": w3, "b3": b3}


def _reference(state, u, params):
    """Pure-JAX reference matching the PyTorch forward semantics."""
    bs = state.shape[0]
    x = jnp.concatenate([state, u], axis=-1).reshape(bs, -1)

    def cell(carry, x_t):
        h, c = carry
        g = x_t @ params["w_ih"] + params["b"][0] + h @ params["w_hh"]
        i_g = jax.nn.sigmoid(g[0 * H:1 * H])
        f_g = jax.nn.sigmoid(g[1 * H:2 * H])
        g_g = jnp.tanh(g[2 * H:3 * H])
        o_g = jax.nn.sigmoid(g[3 * H:4 * H])
        c = f_g * c + i_g * g_g
        h = o_g * jnp.tanh(c)
        return (h, c), h

    init = (jnp.zeros((H,), jnp.float32), jnp.zeros((H,), jnp.float32))
    _, hs = lax.scan(cell, init, x)                    # (bs, H)
    y = jnp.maximum(hs, 0.0)
    y = jnp.maximum(y @ params["w2"] + params["b2"], 0.0)
    return jnp.tanh(y @ params["w3"] + params["b3"])


if __name__ == "__main__":
    n_state, m_control, traj_len = 4, 3, 8

    key = jax.random.PRNGKey(0)
    k_params, k_state, k_u, k_state2, k_u2 = jax.random.split(key, 5)
    params = init_params(k_params, n_state, m_control, traj_len)

    # Case 1: small batch, single grid step.
    bs = 2
    state = jax.random.normal(k_state, (bs, traj_len, n_state), jnp.float32)
    u = jax.random.normal(k_u, (bs, traj_len, m_control), jnp.float32)
    gamma = jax.block_until_ready(gamma_linear_lstm(state, u, params))
    gamma_ref = _reference(state, u, params)
    assert gamma.shape == (bs, m_control)
    assert jnp.allclose(gamma, gamma_ref, atol=1e-3, rtol=1e-3), "mismatch (bs=2)"

    # Case 2: multi-tile grid (exercises the h/c carry across grid steps and
    # ragged batch padding).
    bs2 = 40
    state2 = jax.random.normal(k_state2, (bs2, traj_len, n_state), jnp.float32)
    u2 = jax.random.normal(k_u2, (bs2, traj_len, m_control), jnp.float32)
    gamma2 = jax.block_until_ready(
        gamma_linear_lstm(state2, u2, params, tile_b_max=16))
    gamma2_ref = _reference(state2, u2, params)
    assert gamma2.shape == (bs2, m_control)
    assert jnp.allclose(gamma2, gamma2_ref, atol=1e-3, rtol=1e-3), "mismatch (bs=40)"

    print("KERNEL_OK")
</pallas_src>

<mosaic_0001>
module attributes {stable_mosaic.version = 11 : i64} {
  func.func @_gamma_lstm_kernel(%arg0: i32, %arg1: memref<8x128xf32, #tpu.memory_space<vmem>>, %arg2: memref<128x512xf32, #tpu.memory_space<vmem>>, %arg3: memref<128x512xf32, #tpu.memory_space<vmem>>, %arg4: memref<1x512xf32, #tpu.memory_space<vmem>>, %arg5: memref<128x128xf32, #tpu.memory_space<vmem>>, %arg6: memref<1x128xf32, #tpu.memory_space<vmem>>, %arg7: memref<128x128xf32, #tpu.memory_space<vmem>>, %arg8: memref<1x128xf32, #tpu.memory_space<vmem>>, %arg9: memref<8x128xf32, #tpu.memory_space<vmem>>, %arg10: memref<1x128xf32, #tpu.memory_space<vmem>>, %arg11: memref<1x128xf32, #tpu.memory_space<vmem>>, %arg12: memref<8x512xf32, #tpu.memory_space<vmem>>, %arg13: memref<8x128xf32, #tpu.memory_space<vmem>>) attributes {dimension_semantics = [#tpu.dimension_semantics<arbitrary>], iteration_bounds = array<i64: 1>, scalar_prefetch = 0 : i64, scratch_operands = 4 : i64, tpu.core_type = #tpu.core_type<tc>, window_params = [{transform_indices = @transform_0, window_bounds = array<i64: 8, 128>}, {pipeline_mode = #tpu.pipeline_mode<synchronous>, transform_indices = @transform_1, window_bounds = array<i64: 128, 512>}, {pipeline_mode = #tpu.pipeline_mode<synchronous>, transform_indices = @transform_2, window_bounds = array<i64: 128, 512>}, {pipeline_mode = #tpu.pipeline_mode<synchronous>, transform_indices = @transform_3, window_bounds = array<i64: 1, 512>}, {pipeline_mode = #tpu.pipeline_mode<synchronous>, transform_indices = @transform_4, window_bounds = array<i64: 128, 128>}, {pipeline_mode = #tpu.pipeline_mode<synchronous>, transform_indices = @transform_5, window_bounds = array<i64: 1, 128>}, {pipeline_mode = #tpu.pipeline_mode<synchronous>, transform_indices = @transform_6, window_bounds = array<i64: 128, 128>}, {pipeline_mode = #tpu.pipeline_mode<synchronous>, transform_indices = @transform_7, window_bounds = array<i64: 1, 128>}, {transform_indices = @transform_8, window_bounds = array<i64: 8, 128>}]} {
    %c0_i32 = arith.constant 0 : i32
    %0 = arith.cmpi eq, %arg0, %c0_i32 : i32
    %1 = arith.extui %0 : i1 to i32
    %c0_i32_0 = arith.constant 0 : i32
    %2 = arith.cmpi ne, %1, %c0_i32_0 : i32
    scf.if %2 {
      %cst_104 = arith.constant 0.000000e+00 : f32
      %245 = vector.broadcast %cst_104 : f32 to vector<1x128xf32>
      %c0_105 = arith.constant 0 : index
      %c0_106 = arith.constant 0 : index
      %246 = vector.load %arg10[%c0_105, %c0_106] : memref<1x128xf32, #tpu.memory_space<vmem>>, vector<1x128xf32>
      tpu.vector_store %arg10[%c0_105, %c0_106], %245 {strides = array<i32>} : memref<1x128xf32, #tpu.memory_space<vmem>>, vector<1x128xf32>,
      %cst_107 = arith.constant 0.000000e+00 : f32
      %247 = vector.broadcast %cst_107 : f32 to vector<1x128xf32>
      %c0_108 = arith.constant 0 : index
      %c0_109 = arith.constant 0 : index
      %248 = vector.load %arg11[%c0_108, %c0_109] : memref<1x128xf32, #tpu.memory_space<vmem>>, vector<1x128xf32>
      tpu.vector_store %arg11[%c0_108, %c0_109], %247 {strides = array<i32>} : memref<1x128xf32, #tpu.memory_space<vmem>>, vector<1x128xf32>,
    } else {
    }
    %c0 = arith.constant 0 : index
    %c0_1 = arith.constant 0 : index
    %3 = vector.load %arg1[%c0, %c0_1] : memref<8x128xf32, #tpu.memory_space<vmem>>, vector<8x128xf32>
    %c0_2 = arith.constant 0 : index
    %c0_3 = arith.constant 0 : index
    %4 = vector.load %arg2[%c0_2, %c0_3] : memref<128x512xf32, #tpu.memory_space<vmem>>, vector<128x512xf32>
    %cst = arith.constant dense<0.000000e+00> : vector<8x512xf32>
    %5 = tpu.matmul %3, %4, %cst {dimension_numbers = #tpu.dot_dimension_numbers<[1], [0], [0], [1], [0, 0, 1, 1], [], []>} : vector<8x128xf32>, vector<128x512xf32>, vector<8x512xf32> -> vector<8x512xf32>
    %c0_4 = arith.constant 0 : index
    %c0_5 = arith.constant 0 : index
    %6 = vector.load %arg4[%c0_4, %c0_5] : memref<1x512xf32, #tpu.memory_space<vmem>>, vector<1x512xf32>
    %7 = vector.broadcast %6 : vector<1x512xf32> to vector<8x512xf32>
    %8 = arith.addf %5, %7 : vector<8x512xf32>
    %c0_6 = arith.constant 0 : index
    %c0_7 = arith.constant 0 : index
    %9 = vector.load %arg12[%c0_6, %c0_7] : memref<8x512xf32, #tpu.memory_space<vmem>>, vector<8x512xf32>
    tpu.vector_store %arg12[%c0_6, %c0_7], %8 {strides = array<i32>} : memref<8x512xf32, #tpu.memory_space<vmem>>, vector<8x512xf32>,
    %c0_8 = arith.constant 0 : index
    %c0_9 = arith.constant 0 : index
    %10 = vector.load %arg10[%c0_8, %c0_9] : memref<1x128xf32, #tpu.memory_space<vmem>>, vector<1x128xf32>
    %c0_10 = arith.constant 0 : index
    %c0_11 = arith.constant 0 : index
    %11 = vector.load %arg11[%c0_10, %c0_11] : memref<1x128xf32, #tpu.memory_space<vmem>>, vector<1x128xf32>
    %c0_i32_12 = arith.constant 0 : i32
    %12 = arith.index_cast %c0_i32_12 : i32 to index
    %c0_13 = arith.constant 0 : index
    %13 = vector.load %arg12[%12, %c0_13] : memref<8x512xf32, #tpu.memory_space<vmem>>, vector<1x512xf32>
    %c0_14 = arith.constant 0 : index
    %c0_15 = arith.constant 0 : index
    %14 = vector.load %arg3[%c0_14, %c0_15] : memref<128x512xf32, #tpu.memory_space<vmem>>, vector<128x512xf32>
    %cst_16 = arith.constant dense<0.000000e+00> : vector<1x512xf32>
    %15 = tpu.matmul %10, %14, %cst_16 {dimension_numbers = #tpu.dot_dimension_numbers<[1], [0], [0], [1], [0, 0, 1, 1], [], []>} : vector<1x128xf32>, vector<128x512xf32>, vector<1x512xf32> -> vector<1x512xf32>
    %16 = arith.addf %13, %15 : vector<1x512xf32>
    %17 = arith.negf %16 : vector<1x512xf32>
    %18 = math.exp %17 : vector<1x512xf32>
    %cst_17 = arith.constant 1.000000e+00 : f32
    %19 = vector.broadcast %cst_17 : f32 to vector<1x512xf32>
    %20 = arith.addf %19, %18 : vector<1x512xf32>
    %21 = arith.divf %19, %20 : vector<1x512xf32>
    %22 = vector.extract_strided_slice %21 {offsets = [0, 0], sizes = [1, 128], strides = [1, 1]} : vector<1x512xf32> to vector<1x128xf32>
    %23 = vector.extract_strided_slice %21 {offsets = [0, 128], sizes = [1, 128], strides = [1, 1]} : vector<1x512xf32> to vector<1x128xf32>
    %24 = vector.extract_strided_slice %21 {offsets = [0, 256], sizes = [1, 128], strides = [1, 1]} : vector<1x512xf32> to vector<1x128xf32>
    %cst_18 = arith.constant 2.000000e+00 : f32
    %25 = vector.broadcast %cst_18 : f32 to vector<1x128xf32>
    %26 = arith.mulf %25, %24 : vector<1x128xf32>
    %cst_19 = arith.constant 1.000000e+00 : f32
    %27 = vector.broadcast %cst_19 : f32 to vector<1x128xf32>
    %28 = arith.subf %26, %27 : vector<1x128xf32>
    %29 = vector.extract_strided_slice %21 {offsets = [0, 384], sizes = [1, 128], strides = [1, 1]} : vector<1x512xf32> to vector<1x128xf32>
    %30 = arith.mulf %23, %11 : vector<1x128xf32>
    %31 = arith.mulf %22, %28 : vector<1x128xf32>
    %32 = arith.addf %30, %31 : vector<1x128xf32>
    %33 = math.tanh %32 : vector<1x128xf32>
    %34 = arith.mulf %29, %33 : vector<1x128xf32>
    %cst_20 = arith.constant 0.000000e+00 : f32
    %35 = vector.broadcast %cst_20 : f32 to vector<1x128xf32>
    %36 = arith.maximumf %34, %35 : vector<1x128xf32>
    %37 = arith.index_cast %c0_i32_12 : i32 to index
    %c0_21 = arith.constant 0 : index
    %38 = vector.load %arg13[%37, %c0_21] : memref<8x128xf32, #tpu.memory_space<vmem>>, vector<1x128xf32>
    tpu.vector_store %arg13[%37, %c0_21], %36 {strides = array<i32>} : memref<8x128xf32, #tpu.memory_space<vmem>>, vector<1x128xf32>,
    %c1_i32 = arith.constant 1 : i32
    %39 = arith.index_cast %c1_i32 : i32 to index
    %c0_22 = arith.constant 0 : index
    %40 = vector.load %arg12[%39, %c0_22] : memref<8x512xf32, #tpu.memory_space<vmem>>, vector<1x512xf32>
    %c0_23 = arith.constant 0 : index
    %c0_24 = arith.constant 0 : index
    %41 = vector.load %arg3[%c0_23, %c0_24] : memref<128x512xf32, #tpu.memory_space<vmem>>, vector<128x512xf32>
    %cst_25 = arith.constant dense<0.000000e+00> : vector<1x512xf32>
    %42 = tpu.matmul %34, %41, %cst_25 {dimension_numbers = #tpu.dot_dimension_numbers<[1], [0], [0], [1], [0, 0, 1, 1], [], []>} : vector<1x128xf32>, vector<128x512xf32>, vector<1x512xf32> -> vector<1x512xf32>
    %43 = arith.addf %40, %42 : vector<1x512xf32>
    %44 = arith.negf %43 : vector<1x512xf32>
    %45 = math.exp %44 : vector<1x512xf32>
    %cst_26 = arith.constant 1.000000e+00 : f32
    %46 = vector.broadcast %cst_26 : f32 to vector<1x512xf32>
    %47 = arith.addf %46, %45 : vector<1x512xf32>
    %48 = arith.divf %46, %47 : vector<1x512xf32>
    %49 = vector.extract_strided_slice %48 {offsets = [0, 0], sizes = [1, 128], strides = [1, 1]} : vector<1x512xf32> to vector<1x128xf32>
    %50 = vector.extract_strided_slice %48 {offsets = [0, 128], sizes = [1, 128], strides = [1, 1]} : vector<1x512xf32> to vector<1x128xf32>
    %51 = vector.extract_strided_slice %48 {offsets = [0, 256], sizes = [1, 128], strides = [1, 1]} : vector<1x512xf32> to vector<1x128xf32>
    %cst_27 = arith.constant 2.000000e+00 : f32
    %52 = vector.broadcast %cst_27 : f32 to vector<1x128xf32>
    %53 = arith.mulf %52, %51 : vector<1x128xf32>
    %cst_28 = arith.constant 1.000000e+00 : f32
    %54 = vector.broadcast %cst_28 : f32 to vector<1x128xf32>
    %55 = arith.subf %53, %54 : vector<1x128xf32>
    %56 = vector.extract_strided_slice %48 {offsets = [0, 384], sizes = [1, 128], strides = [1, 1]} : vector<1x512xf32> to vector<1x128xf32>
    %57 = arith.mulf %50, %32 : vector<1x128xf32>
    %58 = arith.mulf %49, %55 : vector<1x128xf32>
    %59 = arith.addf %57, %58 : vector<1x128xf32>
    %60 = math.tanh %59 : vector<1x128xf32>
    %61 = arith.mulf %56, %60 : vector<1x128xf32>
    %cst_29 = arith.constant 0.000000e+00 : f32
    %62 = vector.broadcast %cst_29 : f32 to vector<1x128xf32>
    %63 = arith.maximumf %61, %62 : vector<1x128xf32>
    %64 = arith.index_cast %c1_i32 : i32 to index
    %c0_30 = arith.constant 0 : index
    %65 = vector.load %arg13[%64, %c0_30] : memref<8x128xf32, #tpu.memory_space<vmem>>, vector<1x128xf32>
    tpu.vector_store %arg13[%64, %c0_30], %63 {strides = array<i32>} : memref<8x128xf32, #tpu.memory_space<vmem>>, vector<1x128xf32>,
    %c2_i32 = arith.constant 2 : i32
    %66 = arith.index_cast %c2_i32 : i32 to index
    %c0_31 = arith.constant 0 : index
    %67 = vector.load %arg12[%66, %c0_31] : memref<8x512xf32, #tpu.memory_space<vmem>>, vector<1x512xf32>
    %c0_32 = arith.constant 0 : index
    %c0_33 = arith.constant 0 : index
    %68 = vector.load %arg3[%c0_32, %c0_33] : memref<128x512xf32, #tpu.memory_space<vmem>>, vector<128x512xf32>
    %cst_34 = arith.constant dense<0.000000e+00> : vector<1x512xf32>
    %69 = tpu.matmul %61, %68, %cst_34 {dimension_numbers = #tpu.dot_dimension_numbers<[1], [0], [0], [1], [0, 0, 1, 1], [], []>} : vector<1x128xf32>, vector<128x512xf32>, vector<1x512xf32> -> vector<1x512xf32>
    %70 = arith.addf %67, %69 : vector<1x512xf32>
    %71 = arith.negf %70 : vector<1x512xf32>
    %72 = math.exp %71 : vector<1x512xf32>
    %cst_35 = arith.constant 1.000000e+00 : f32
    %73 = vector.broadcast %cst_35 : f32 to vector<1x512xf32>
    %74 = arith.addf %73, %72 : vector<1x512xf32>
    %75 = arith.divf %73, %74 : vector<1x512xf32>
    %76 = vector.extract_strided_slice %75 {offsets = [0, 0], sizes = [1, 128], strides = [1, 1]} : vector<1x512xf32> to vector<1x128xf32>
    %77 = vector.extract_strided_slice %75 {offsets = [0, 128], sizes = [1, 128], strides = [1, 1]} : vector<1x512xf32> to vector<1x128xf32>
    %78 = vector.extract_strided_slice %75 {offsets = [0, 256], sizes = [1, 128], strides = [1, 1]} : vector<1x512xf32> to vector<1x128xf32>
    %cst_36 = arith.constant 2.000000e+00 : f32
    %79 = vector.broadcast %cst_36 : f32 to vector<1x128xf32>
    %80 = arith.mulf %79, %78 : vector<1x128xf32>
    %cst_37 = arith.constant 1.000000e+00 : f32
    %81 = vector.broadcast %cst_37 : f32 to vector<1x128xf32>
    %82 = arith.subf %80, %81 : vector<1x128xf32>
    %83 = vector.extract_strided_slice %75 {offsets = [0, 384], sizes = [1, 128], strides = [1, 1]} : vector<1x512xf32> to vector<1x128xf32>
    %84 = arith.mulf %77, %59 : vector<1x128xf32>
    %85 = arith.mulf %76, %82 : vector<1x128xf32>
    %86 = arith.addf %84, %85 : vector<1x128xf32>
    %87 = math.tanh %86 : vector<1x128xf32>
    %88 = arith.mulf %83, %87 : vector<1x128xf32>
    %cst_38 = arith.constant 0.000000e+00 : f32
    %89 = vector.broadcast %cst_38 : f32 to vector<1x128xf32>
    %90 = arith.maximumf %88, %89 : vector<1x128xf32>
    %91 = arith.index_cast %c2_i32 : i32 to index
    %c0_39 = arith.constant 0 : index
    %92 = vector.load %arg13[%91, %c0_39] : memref<8x128xf32, #tpu.memory_space<vmem>>, vector<1x128xf32>
    tpu.vector_store %arg13[%91, %c0_39], %90 {strides = array<i32>} : memref<8x128xf32, #tpu.memory_space<vmem>>, vector<1x128xf32>,
    %c3_i32 = arith.constant 3 : i32
    %93 = arith.index_cast %c3_i32 : i32 to index
    %c0_40 = arith.constant 0 : index
    %94 = vector.load %arg12[%93, %c0_40] : memref<8x512xf32, #tpu.memory_space<vmem>>, vector<1x512xf32>
    %c0_41 = arith.constant 0 : index
    %c0_42 = arith.constant 0 : index
    %95 = vector.load %arg3[%c0_41, %c0_42] : memref<128x512xf32, #tpu.memory_space<vmem>>, vector<128x512xf32>
    %cst_43 = arith.constant dense<0.000000e+00> : vector<1x512xf32>
    %96 = tpu.matmul %88, %95, %cst_43 {dimension_numbers = #tpu.dot_dimension_numbers<[1], [0], [0], [1], [0, 0, 1, 1], [], []>} : vector<1x128xf32>, vector<128x512xf32>, vector<1x512xf32> -> vector<1x512xf32>
    %97 = arith.addf %94, %96 : vector<1x512xf32>
    %98 = arith.negf %97 : vector<1x512xf32>
    %99 = math.exp %98 : vector<1x512xf32>
    %cst_44 = arith.constant 1.000000e+00 : f32
    %100 = vector.broadcast %cst_44 : f32 to vector<1x512xf32>
    %101 = arith.addf %100, %99 : vector<1x512xf32>
    %102 = arith.divf %100, %101 : vector<1x512xf32>
    %103 = vector.extract_strided_slice %102 {offsets = [0, 0], sizes = [1, 128], strides = [1, 1]} : vector<1x512xf32> to vector<1x128xf32>
    %104 = vector.extract_strided_slice %102 {offsets = [0, 128], sizes = [1, 128], strides = [1, 1]} : vector<1x512xf32> to vector<1x128xf32>
    %105 = vector.extract_strided_slice %102 {offsets = [0, 256], sizes = [1, 128], strides = [1, 1]} : vector<1x512xf32> to vector<1x128xf32>
    %cst_45 = arith.constant 2.000000e+00 : f32
    %106 = vector.broadcast %cst_45 : f32 to vector<1x128xf32>
    %107 = arith.mulf %106, %105 : vector<1x128xf32>
    %cst_46 = arith.constant 1.000000e+00 : f32
    %108 = vector.broadcast %cst_46 : f32 to vector<1x128xf32>
    %109 = arith.subf %107, %108 : vector<1x128xf32>
    %110 = vector.extract_strided_slice %102 {offsets = [0, 384], sizes = [1, 128], strides = [1, 1]} : vector<1x512xf32> to vector<1x128xf32>
    %111 = arith.mulf %104, %86 : vector<1x128xf32>
    %112 = arith.mulf %103, %109 : vector<1x128xf32>
    %113 = arith.addf %111, %112 : vector<1x128xf32>
    %114 = math.tanh %113 : vector<1x128xf32>
    %115 = arith.mulf %110, %114 : vector<1x128xf32>
    %cst_47 = arith.constant 0.000000e+00 : f32
    %116 = vector.broadcast %cst_47 : f32 to vector<1x128xf32>
    %117 = arith.maximumf %115, %116 : vector<1x128xf32>
    %118 = arith.index_cast %c3_i32 : i32 to index
    %c0_48 = arith.constant 0 : index
    %119 = vector.load %arg13[%118, %c0_48] : memref<8x128xf32, #tpu.memory_space<vmem>>, vector<1x128xf32>
    tpu.vector_store %arg13[%118, %c0_48], %117 {strides = array<i32>} : memref<8x128xf32, #tpu.memory_space<vmem>>, vector<1x128xf32>,
    %c4_i32 = arith.constant 4 : i32
    %120 = arith.index_cast %c4_i32 : i32 to index
    %c0_49 = arith.constant 0 : index
    %121 = vector.load %arg12[%120, %c0_49] : memref<8x512xf32, #tpu.memory_space<vmem>>, vector<1x512xf32>
    %c0_50 = arith.constant 0 : index
    %c0_51 = arith.constant 0 : index
    %122 = vector.load %arg3[%c0_50, %c0_51] : memref<128x512xf32, #tpu.memory_space<vmem>>, vector<128x512xf32>
    %cst_52 = arith.constant dense<0.000000e+00> : vector<1x512xf32>
    %123 = tpu.matmul %115, %122, %cst_52 {dimension_numbers = #tpu.dot_dimension_numbers<[1], [0], [0], [1], [0, 0, 1, 1], [], []>} : vector<1x128xf32>, vector<128x512xf32>, vector<1x512xf32> -> vector<1x512xf32>
    %124 = arith.addf %121, %123 : vector<1x512xf32>
    %125 = arith.negf %124 : vector<1x512xf32>
    %126 = math.exp %125 : vector<1x512xf32>
    %cst_53 = arith.constant 1.000000e+00 : f32
    %127 = vector.broadcast %cst_53 : f32 to vector<1x512xf32>
    %128 = arith.addf %127, %126 : vector<1x512xf32>
    %129 = arith.divf %127, %128 : vector<1x512xf32>
    %130 = vector.extract_strided_slice %129 {offsets = [0, 0], sizes = [1, 128], strides = [1, 1]} : vector<1x512xf32> to vector<1x128xf32>
    %131 = vector.extract_strided_slice %129 {offsets = [0, 128], sizes = [1, 128], strides = [1, 1]} : vector<1x512xf32> to vector<1x128xf32>
    %132 = vector.extract_strided_slice %129 {offsets = [0, 256], sizes = [1, 128], strides = [1, 1]} : vector<1x512xf32> to vector<1x128xf32>
    %cst_54 = arith.constant 2.000000e+00 : f32
    %133 = vector.broadcast %cst_54 : f32 to vector<1x128xf32>
    %134 = arith.mulf %133, %132 : vector<1x128xf32>
    %cst_55 = arith.constant 1.000000e+00 : f32
    %135 = vector.broadcast %cst_55 : f32 to vector<1x128xf32>
    %136 = arith.subf %134, %135 : vector<1x128xf32>
    %137 = vector.extract_strided_slice %129 {offsets = [0, 384], sizes = [1, 128], strides = [1, 1]} : vector<1x512xf32> to vector<1x128xf32>
    %138 = arith.mulf %131, %113 : vector<1x128xf32>
    %139 = arith.mulf %130, %136 : vector<1x128xf32>
    %140 = arith.addf %138, %139 : vector<1x128xf32>
    %141 = math.tanh %140 : vector<1x128xf32>
    %142 = arith.mulf %137, %141 : vector<1x128xf32>
    %cst_56 = arith.constant 0.000000e+00 : f32
    %143 = vector.broadcast %cst_56 : f32 to vector<1x128xf32>
    %144 = arith.maximumf %142, %143 : vector<1x128xf32>
    %145 = arith.index_cast %c4_i32 : i32 to index
    %c0_57 = arith.constant 0 : index
    %146 = vector.load %arg13[%145, %c0_57] : memref<8x128xf32, #tpu.memory_space<vmem>>, vector<1x128xf32>
    tpu.vector_store %arg13[%145, %c0_57], %144 {strides = array<i32>} : memref<8x128xf32, #tpu.memory_space<vmem>>, vector<1x128xf32>,
    %c5_i32 = arith.constant 5 : i32
    %147 = arith.index_cast %c5_i32 : i32 to index
    %c0_58 = arith.constant 0 : index
    %148 = vector.load %arg12[%147, %c0_58] : memref<8x512xf32, #tpu.memory_space<vmem>>, vector<1x512xf32>
    %c0_59 = arith.constant 0 : index
    %c0_60 = arith.constant 0 : index
    %149 = vector.load %arg3[%c0_59, %c0_60] : memref<128x512xf32, #tpu.memory_space<vmem>>, vector<128x512xf32>
    %cst_61 = arith.constant dense<0.000000e+00> : vector<1x512xf32>
    %150 = tpu.matmul %142, %149, %cst_61 {dimension_numbers = #tpu.dot_dimension_numbers<[1], [0], [0], [1], [0, 0, 1, 1], [], []>} : vector<1x128xf32>, vector<128x512xf32>, vector<1x512xf32> -> vector<1x512xf32>
    %151 = arith.addf %148, %150 : vector<1x512xf32>
    %152 = arith.negf %151 : vector<1x512xf32>
    %153 = math.exp %152 : vector<1x512xf32>
    %cst_62 = arith.constant 1.000000e+00 : f32
    %154 = vector.broadcast %cst_62 : f32 to vector<1x512xf32>
    %155 = arith.addf %154, %153 : vector<1x512xf32>
    %156 = arith.divf %154, %155 : vector<1x512xf32>
    %157 = vector.extract_strided_slice %156 {offsets = [0, 0], sizes = [1, 128], strides = [1, 1]} : vector<1x512xf32> to vector<1x128xf32>
    %158 = vector.extract_strided_slice %156 {offsets = [0, 128], sizes = [1, 128], strides = [1, 1]} : vector<1x512xf32> to vector<1x128xf32>
    %159 = vector.extract_strided_slice %156 {offsets = [0, 256], sizes = [1, 128], strides = [1, 1]} : vector<1x512xf32> to vector<1x128xf32>
    %cst_63 = arith.constant 2.000000e+00 : f32
    %160 = vector.broadcast %cst_63 : f32 to vector<1x128xf32>
    %161 = arith.mulf %160, %159 : vector<1x128xf32>
    %cst_64 = arith.constant 1.000000e+00 : f32
    %162 = vector.broadcast %cst_64 : f32 to vector<1x128xf32>
    %163 = arith.subf %161, %162 : vector<1x128xf32>
    %164 = vector.extract_strided_slice %156 {offsets = [0, 384], sizes = [1, 128], strides = [1, 1]} : vector<1x512xf32> to vector<1x128xf32>
    %165 = arith.mulf %158, %140 : vector<1x128xf32>
    %166 = arith.mulf %157, %163 : vector<1x128xf32>
    %167 = arith.addf %165, %166 : vector<1x128xf32>
    %168 = math.tanh %167 : vector<1x128xf32>
    %169 = arith.mulf %164, %168 : vector<1x128xf32>
    %cst_65 = arith.constant 0.000000e+00 : f32
    %170 = vector.broadcast %cst_65 : f32 to vector<1x128xf32>
    %171 = arith.maximumf %169, %170 : vector<1x128xf32>
    %172 = arith.index_cast %c5_i32 : i32 to index
    %c0_66 = arith.constant 0 : index
    %173 = vector.load %arg13[%172, %c0_66] : memref<8x128xf32, #tpu.memory_space<vmem>>, vector<1x128xf32>
    tpu.vector_store %arg13[%172, %c0_66], %171 {strides = array<i32>} : memref<8x128xf32, #tpu.memory_space<vmem>>, vector<1x128xf32>,
    %c6_i32 = arith.constant 6 : i32
    %174 = arith.index_cast %c6_i32 : i32 to index
    %c0_67 = arith.constant 0 : index
    %175 = vector.load %arg12[%174, %c0_67] : memref<8x512xf32, #tpu.memory_space<vmem>>, vector<1x512xf32>
    %c0_68 = arith.constant 0 : index
    %c0_69 = arith.constant 0 : index
    %176 = vector.load %arg3[%c0_68, %c0_69] : memref<128x512xf32, #tpu.memory_space<vmem>>, vector<128x512xf32>
    %cst_70 = arith.constant dense<0.000000e+00> : vector<1x512xf32>
    %177 = tpu.matmul %169, %176, %cst_70 {dimension_numbers = #tpu.dot_dimension_numbers<[1], [0], [0], [1], [0, 0, 1, 1], [], []>} : vector<1x128xf32>, vector<128x512xf32>, vector<1x512xf32> -> vector<1x512xf32>
    %178 = arith.addf %175, %177 : vector<1x512xf32>
    %179 = arith.negf %178 : vector<1x512xf32>
    %180 = math.exp %179 : vector<1x512xf32>
    %cst_71 = arith.constant 1.000000e+00 : f32
    %181 = vector.broadcast %cst_71 : f32 to vector<1x512xf32>
    %182 = arith.addf %181, %180 : vector<1x512xf32>
    %183 = arith.divf %181, %182 : vector<1x512xf32>
    %184 = vector.extract_strided_slice %183 {offsets = [0, 0], sizes = [1, 128], strides = [1, 1]} : vector<1x512xf32> to vector<1x128xf32>
    %185 = vector.extract_strided_slice %183 {offsets = [0, 128], sizes = [1, 128], strides = [1, 1]} : vector<1x512xf32> to vector<1x128xf32>
    %186 = vector.extract_strided_slice %183 {offsets = [0, 256], sizes = [1, 128], strides = [1, 1]} : vector<1x512xf32> to vector<1x128xf32>
    %cst_72 = arith.constant 2.000000e+00 : f32
    %187 = vector.broadcast %cst_72 : f32 to vector<1x128xf32>
    %188 = arith.mulf %187, %186 : vector<1x128xf32>
    %cst_73 = arith.constant 1.000000e+00 : f32
    %189 = vector.broadcast %cst_73 : f32 to vector<1x128xf32>
    %190 = arith.subf %188, %189 : vector<1x128xf32>
    %191 = vector.extract_strided_slice %183 {offsets = [0, 384], sizes = [1, 128], strides = [1, 1]} : vector<1x512xf32> to vector<1x128xf32>
    %192 = arith.mulf %185, %167 : vector<1x128xf32>
    %193 = arith.mulf %184, %190 : vector<1x128xf32>
    %194 = arith.addf %192, %193 : vector<1x128xf32>
    %195 = math.tanh %194 : vector<1x128xf32>
    %196 = arith.mulf %191, %195 : vector<1x128xf32>
    %cst_74 = arith.constant 0.000000e+00 : f32
    %197 = vector.broadcast %cst_74 : f32 to vector<1x128xf32>
    %198 = arith.maximumf %196, %197 : vector<1x128xf32>
    %199 = arith.index_cast %c6_i32 : i32 to index
    %c0_75 = arith.constant 0 : index
    %200 = vector.load %arg13[%199, %c0_75] : memref<8x128xf32, #tpu.memory_space<vmem>>, vector<1x128xf32>
    tpu.vector_store %arg13[%199, %c0_75], %198 {strides = array<i32>} : memref<8x128xf32, #tpu.memory_space<vmem>>, vector<1x128xf32>,
    %c7_i32 = arith.constant 7 : i32
    %201 = arith.index_cast %c7_i32 : i32 to index
    %c0_76 = arith.constant 0 : index
    %202 = vector.load %arg12[%201, %c0_76] : memref<8x512xf32, #tpu.memory_space<vmem>>, vector<1x512xf32>
    %c0_77 = arith.constant 0 : index
    %c0_78 = arith.constant 0 : index
    %203 = vector.load %arg3[%c0_77, %c0_78] : memref<128x512xf32, #tpu.memory_space<vmem>>, vector<128x512xf32>
    %cst_79 = arith.constant dense<0.000000e+00> : vector<1x512xf32>
    %204 = tpu.matmul %196, %203, %cst_79 {dimension_numbers = #tpu.dot_dimension_numbers<[1], [0], [0], [1], [0, 0, 1, 1], [], []>} : vector<1x128xf32>, vector<128x512xf32>, vector<1x512xf32> -> vector<1x512xf32>
    %205 = arith.addf %202, %204 : vector<1x512xf32>
    %206 = arith.negf %205 : vector<1x512xf32>
    %207 = math.exp %206 : vector<1x512xf32>
    %cst_80 = arith.constant 1.000000e+00 : f32
    %208 = vector.broadcast %cst_80 : f32 to vector<1x512xf32>
    %209 = arith.addf %208, %207 : vector<1x512xf32>
    %210 = arith.divf %208, %209 : vector<1x512xf32>
    %211 = vector.extract_strided_slice %210 {offsets = [0, 0], sizes = [1, 128], strides = [1, 1]} : vector<1x512xf32> to vector<1x128xf32>
    %212 = vector.extract_strided_slice %210 {offsets = [0, 128], sizes = [1, 128], strides = [1, 1]} : vector<1x512xf32> to vector<1x128xf32>
    %213 = vector.extract_strided_slice %210 {offsets = [0, 256], sizes = [1, 128], strides = [1, 1]} : vector<1x512xf32> to vector<1x128xf32>
    %cst_81 = arith.constant 2.000000e+00 : f32
    %214 = vector.broadcast %cst_81 : f32 to vector<1x128xf32>
    %215 = arith.mulf %214, %213 : vector<1x128xf32>
    %cst_82 = arith.constant 1.000000e+00 : f32
    %216 = vector.broadcast %cst_82 : f32 to vector<1x128xf32>
    %217 = arith.subf %215, %216 : vector<1x128xf32>
    %218 = vector.extract_strided_slice %210 {offsets = [0, 384], sizes = [1, 128], strides = [1, 1]} : vector<1x512xf32> to vector<1x128xf32>
    %219 = arith.mulf %212, %194 : vector<1x128xf32>
    %220 = arith.mulf %211, %217 : vector<1x128xf32>
    %221 = arith.addf %219, %220 : vector<1x128xf32>
    %222 = math.tanh %221 : vector<1x128xf32>
    %223 = arith.mulf %218, %222 : vector<1x128xf32>
    %cst_83 = arith.constant 0.000000e+00 : f32
    %224 = vector.broadcast %cst_83 : f32 to vector<1x128xf32>
    %225 = arith.maximumf %223, %224 : vector<1x128xf32>
    %226 = arith.index_cast %c7_i32 : i32 to index
    %c0_84 = arith.constant 0 : index
    %227 = vector.load %arg13[%226, %c0_84] : memref<8x128xf32, #tpu.memory_space<vmem>>, vector<1x128xf32>
    tpu.vector_store %arg13[%226, %c0_84], %225 {strides = array<i32>} : memref<8x128xf32, #tpu.memory_space<vmem>>, vector<1x128xf32>,
    %c8_i32 = arith.constant 8 : i32
    %c0_85 = arith.constant 0 : index
    %c0_86 = arith.constant 0 : index
    %228 = vector.load %arg10[%c0_85, %c0_86] : memref<1x128xf32, #tpu.memory_space<vmem>>, vector<1x128xf32>
    tpu.vector_store %arg10[%c0_85, %c0_86], %223 {strides = array<i32>} : memref<1x128xf32, #tpu.memory_space<vmem>>, vector<1x128xf32>,
    %c0_87 = arith.constant 0 : index
    %c0_88 = arith.constant 0 : index
    %229 = vector.load %arg11[%c0_87, %c0_88] : memref<1x128xf32, #tpu.memory_space<vmem>>, vector<1x128xf32>
    tpu.vector_store %arg11[%c0_87, %c0_88], %221 {strides = array<i32>} : memref<1x128xf32, #tpu.memory_space<vmem>>, vector<1x128xf32>,
    %c0_89 = arith.constant 0 : index
    %c0_90 = arith.constant 0 : index
    %230 = vector.load %arg13[%c0_89, %c0_90] : memref<8x128xf32, #tpu.memory_space<vmem>>, vector<8x128xf32>
    %c0_91 = arith.constant 0 : index
    %c0_92 = arith.constant 0 : index
    %231 = vector.load %arg5[%c0_91, %c0_92] : memref<128x128xf32, #tpu.memory_space<vmem>>, vector<128x128xf32>
    %cst_93 = arith.constant dense<0.000000e+00> : vector<8x128xf32>
    %232 = tpu.matmul %230, %231, %cst_93 {dimension_numbers = #tpu.dot_dimension_numbers<[1], [0], [0], [1], [0, 0, 1, 1], [], []>} : vector<8x128xf32>, vector<128x128xf32>, vector<8x128xf32> -> vector<8x128xf32>
    %c0_94 = arith.constant 0 : index
    %c0_95 = arith.constant 0 : index
    %233 = vector.load %arg6[%c0_94, %c0_95] : memref<1x128xf32, #tpu.memory_space<vmem>>, vector<1x128xf32>
    %234 = vector.broadcast %233 : vector<1x128xf32> to vector<8x128xf32>
    %235 = arith.addf %232, %234 : vector<8x128xf32>
    %cst_96 = arith.constant 0.000000e+00 : f32
    %236 = vector.broadcast %cst_96 : f32 to vector<8x128xf32>
    %237 = arith.maximumf %235, %236 : vector<8x128xf32>
    %c0_97 = arith.constant 0 : index
    %c0_98 = arith.constant 0 : index
    %238 = vector.load %arg7[%c0_97, %c0_98] : memref<128x128xf32, #tpu.memory_space<vmem>>, vector<128x128xf32>
    %cst_99 = arith.constant dense<0.000000e+00> : vector<8x128xf32>
    %239 = tpu.matmul %237, %238, %cst_99 {dimension_numbers = #tpu.dot_dimension_numbers<[1], [0], [0], [1], [0, 0, 1, 1], [], []>} : vector<8x128xf32>, vector<128x128xf32>, vector<8x128xf32> -> vector<8x128xf32>
    %c0_100 = arith.constant 0 : index
    %c0_101 = arith.constant 0 : index
    %240 = vector.load %arg8[%c0_100, %c0_101] : memref<1x128xf32, #tpu.memory_space<vmem>>, vector<1x128xf32>
    %241 = vector.broadcast %240 : vector<1x128xf32> to vector<8x128xf32>
    %242 = arith.addf %239, %241 : vector<8x128xf32>
    %243 = math.tanh %242 : vector<8x128xf32>
    %c0_102 = arith.constant 0 : index
    %c0_103 = arith.constant 0 : index
    %244 = vector.load %arg9[%c0_102, %c0_103] : memref<8x128xf32, #tpu.memory_space<vmem>>, vector<8x128xf32>
    tpu.vector_store %arg9[%c0_102, %c0_103], %243 {strides = array<i32>} : memref<8x128xf32, #tpu.memory_space<vmem>>, vector<8x128xf32>,
    return
  }
  func.func @transform_0(%arg0: i32) -> (i32, i32) {
    %c0_i32 = arith.constant 0 : i32
    %c0_i32_0 = arith.constant 0 : i32
    return %arg0, %c0_i32 : i32, i32
  }
  func.func @transform_1(%arg0: i32) -> (i32, i32) {
    %c0_i32 = arith.constant 0 : i32
    %c0_i32_0 = arith.constant 0 : i32
    %c0_i32_1 = arith.constant 0 : i32
    return %c0_i32, %c0_i32_0 : i32, i32
  }
  func.func @transform_2(%arg0: i32) -> (i32, i32) {
    %c0_i32 = arith.constant 0 : i32
    %c0_i32_0 = arith.constant 0 : i32
    %c0_i32_1 = arith.constant 0 : i32
    return %c0_i32, %c0_i32_0 : i32, i32
  }
  func.func @transform_3(%arg0: i32) -> (i32, i32) {
    %c0_i32 = arith.constant 0 : i32
    %c0_i32_0 = arith.constant 0 : i32
    %c0_i32_1 = arith.constant 0 : i32
    return %c0_i32, %c0_i32_0 : i32, i32
  }
  func.func @transform_4(%arg0: i32) -> (i32, i32) {
    %c0_i32 = arith.constant 0 : i32
    %c0_i32_0 = arith.constant 0 : i32
    %c0_i32_1 = arith.constant 0 : i32
    return %c0_i32, %c0_i32_0 : i32, i32
  }
  func.func @transform_5(%arg0: i32) -> (i32, i32) {
    %c0_i32 = arith.constant 0 : i32
    %c0_i32_0 = arith.constant 0 : i32
    %c0_i32_1 = arith.constant 0 : i32
    return %c0_i32, %c0_i32_0 : i32, i32
  }
  func.func @transform_6(%arg0: i32) -> (i32, i32) {
    %c0_i32 = arith.constant 0 : i32
    %c0_i32_0 = arith.constant 0 : i32
    %c0_i32_1 = arith.constant 0 : i32
    return %c0_i32, %c0_i32_0 : i32, i32
  }
  func.func @transform_7(%arg0: i32) -> (i32, i32) {
    %c0_i32 = arith.constant 0 : i32
    %c0_i32_0 = arith.constant 0 : i32
    %c0_i32_1 = arith.constant 0 : i32
    return %c0_i32, %c0_i32_0 : i32, i32
  }
  func.func @transform_8(%arg0: i32) -> (i32, i32) {
    %c0_i32 = arith.constant 0 : i32
    %c0_i32_0 = arith.constant 0 : i32
    return %arg0, %c0_i32 : i32, i32
  }
}

</mosaic_0001>

<bundles_post_ra>
// kernel: tpu_custom_call.1
= control target key start
LH: loop header
LB: loop body
LE: loop exit
PB: predicated region body
PF: predicated region fallthrough
CT: control target
= control target key end

     0   :  { %13 = vsyncpa [#allocation7], 0  ;;  %s4210_s0 = inlined_call_operand.hbm [shape: f32[8,128], index: 0, kind: input, shape index: {}]   ;;  %s4211_s1 = inlined_call_operand.hbm [shape: f32[128,512], index: 1, kind: input, shape index: {}]   ;;  %s4212_s2 = inlined_call_operand.hbm [shape: f32[128,512], index: 2, kind: input, shape index: {}]   ;;  %s4213_s3 = inlined_call_operand.vmem [shape: f32[1,512], index: 3, kind: input, shape index: {}]   ;;  %s4214_s4 = inlined_call_operand.hbm [shape: f32[128,128], index: 4, kind: input, shape index: {}]   ;;  %s4215_s5 = inlined_call_operand.vmem [shape: f32[1,128], index: 5, kind: input, shape index: {}]   ;;  %s4216_s6 = inlined_call_operand.hbm [shape: f32[128,128], index: 6, kind: input, shape index: {}]   ;;  %s4217_s7 = inlined_call_operand.vmem [shape: f32[1,128], index: 7, kind: input, shape index: {}]   ;;  %s4218_s8 = inlined_call_operand.hbm [shape: f32[8,128], index: 8, kind: output, shape index: {}]  }
   0x1   :  { %14 = vsyncpa [#allocation10], 0 }
   0x2   :  { %15 = vsyncpa [#allocation13], 0 }
   0x3   :  { %16 = vsyncpa [#allocation8], 0  ;;  %s3575_s27 = smov [#allocation9]   ;;  %s3435_s9 = scalar_lea.hbm %s4211_s1, 8192 }
   0x4   :  { %s32_s28 = sshll.u32 %s3575_s27, 4  ;;  %p3436_p0 = scmp.ne.s32.totalorder %s4211_s1, %s3435_s9  ;;  %s33_s28 = int_to_ptr.vmem [resolvable:$true] %s32_s28 }
   0x5   :  { %p3439_p1 = scmp.lt.u32.totalorder %s3435_s9, %s4211_s1 }
   0x7   :  { %p3441_p2 = pnand %p3439_p1, %p3436_p0 }
   0x9   :  { %3444 = shalt.err (!%p3441_p2)
}
   0xa   :  { %s3445_s14 = scalar_lea.vmem %s33_s28, 8192  ;;  %p3450_p4 = scmp.lt.s32.totalorder %s33_s28, %s33_s28 }
   0xb   :  { %p3446_p3 = scmp.ne.s32.totalorder %s33_s28, %s3445_s14  ;;  %p3451_p5 = scmp.lt.s32.totalorder %s3445_s14, %s3445_s14 }
   0xd   :  { %p3452_p6 = por %p3451_p5, %p3450_p4 }
   0xf   :  { %p3453_p7 = pnand %p3452_p6, %p3446_p3 }
  0x11   :  { %3456 = shalt.err (!%p3453_p7)
}
  0x12   :  { %s3576_s15 = smov 512   ;;  %s3577_s16 = smov 32  }
  0x13   :  { %38 = dma.hbm_to_vmem [thread:$0]  %s4211_s1, 8192, %s33_s28, [#allocation10], %s3576_s15, %s3576_s15, %s3577_s16  }
  0x14   :  { %s3578_s19 = smov [#allocation12]   ;;  %s3457_s23 = scalar_lea.hbm %s4214_s4, 2048 }
  0x15   :  { %s58_s20 = sshll.u32 %s3578_s19, 4  ;;  %p3458_p8 = scmp.ne.s32.totalorder %s4214_s4, %s3457_s23  ;;  %s59_s20 = int_to_ptr.vmem [resolvable:$true] %s58_s20 }
  0x16   :  { %p3461_p9 = scmp.lt.u32.totalorder %s3457_s23, %s4214_s4 }
  0x18   :  { %p3463_p10 = pnand %p3461_p9, %p3458_p8 }
  0x1a   :  { %3466 = shalt.err (!%p3463_p10)
}
  0x1b   :  { %s3467_s29 = scalar_lea.vmem %s59_s20, 2048  ;;  %p3472_p12 = scmp.lt.s32.totalorder %s59_s20, %s59_s20 }
  0x1c   :  { %p3468_p11 = scmp.ne.s32.totalorder %s59_s20, %s3467_s29  ;;  %p3473_p13 = scmp.lt.s32.totalorder %s3467_s29, %s3467_s29 }
  0x1e   :  { %p3474_p0 = por %p3473_p13, %p3472_p12 }
  0x20   :  { %p3475_p1 = pnand %p3474_p0, %p3468_p11 }
  0x22   :  { %3478 = shalt.err (!%p3475_p1)
}
  0x23   :  { %s3579_s1 = smov 128   ;;  %s3580_s28 = smov 8  }
  0x24   :  { %64 = dma.hbm_to_vmem [thread:$0]  %s4214_s4, 2048, %s59_s20, [#allocation13], %s3579_s1, %s3579_s1, %s3580_s28  }
  0x25   :  { %s3581_s10 = smov [#allocation6]   ;;  %s3582_s12 = smov [#allocation11]  }
  0x26   :  { %s23_s11 = sshll.u32 %s3581_s10, 4  ;;  %s44_s13 = sshll.u32 %s3582_s12, 4  ;;  %s24_s11 = int_to_ptr.vmem [resolvable:$true] %s23_s11  ;;  %s3664_s13 = int_to_ptr.vmem [resolvable:$true] %s44_s13 }
  0x27   :  { %s3479_s18 = scalar_lea.hbm %s4210_s0, 128 }
  0x28   :  { %p3480_p2 = scmp.ne.s32.totalorder %s4210_s0, %s3479_s18  ;;  %p3483_p3 = scmp.lt.u32.totalorder %s3479_s18, %s4210_s0 }
  0x2a   :  { %p3485_p4 = pnand %p3483_p3, %p3480_p2 }
  0x2c   :  { %3488 = shalt.err (!%p3485_p4)
}
  0x2d   :  { %s3489_s4 = scalar_lea.vmem %s24_s11, 128  ;;  %p3494_p6 = scmp.lt.s32.totalorder %s24_s11, %s24_s11 }
  0x2e   :  { %p3490_p5 = scmp.ne.s32.totalorder %s24_s11, %s3489_s4  ;;  %p3495_p7 = scmp.lt.s32.totalorder %s3489_s4, %s3489_s4 }
  0x30   :  { %p3496_p8 = por %p3495_p7, %p3494_p6 }
  0x32   :  { %p3497_p9 = pnand %p3496_p8, %p3490_p5 }
  0x34   :  { %3500 = shalt.err (!%p3497_p9)
}
  0x35   :  { %26 = dma.hbm_to_vmem [thread:$0]  %s4210_s0, 128, %s24_s11, [#allocation7]  }
  0x36   :  { %s3501_s27 = scalar_lea.hbm %s4212_s2, 8192 }
  0x37   :  { %p3502_p10 = scmp.ne.s32.totalorder %s4212_s2, %s3501_s27  ;;  %p3505_p11 = scmp.lt.u32.totalorder %s3501_s27, %s4212_s2 }
  0x39   :  { %p3507_p12 = pnand %p3505_p11, %p3502_p10 }
  0x3b   :  { %3510 = shalt.err (!%p3507_p12)
}
  0x3c   :  { %s3511_s12 = scalar_lea.vmem %s3664_s13, 8192  ;;  %p3516_p0 = scmp.lt.s32.totalorder %s3664_s13, %s3664_s13 }
  0x3d   :  { %p3512_p13 = scmp.ne.s32.totalorder %s3664_s13, %s3511_s12  ;;  %p3517_p1 = scmp.lt.s32.totalorder %s3511_s12, %s3511_s12 }
  0x3f   :  { %p3518_p2 = por %p3517_p1, %p3516_p0 }
  0x41   :  { %p3519_p3 = pnand %p3518_p2, %p3512_p13 }
  0x43   :  { %3522 = shalt.err (!%p3519_p3)
}
  0x44   :  { %50 = dma.hbm_to_vmem [thread:$0]  %s4212_s2, 8192, %s3664_s13, [#allocation10], %s3576_s15, %s3576_s15, %s3577_s16  }
  0x45   :  { %s3583_s14 = smov [#allocation14]   ;;  %s3523_s21 = scalar_lea.hbm %s4216_s6, 2048 }
  0x46   :  { %s72_s17 = sshll.u32 %s3583_s14, 4  ;;  %p3524_p4 = scmp.ne.s32.totalorder %s4216_s6, %s3523_s21  ;;  %s73_s17 = int_to_ptr.vmem [resolvable:$true] %s72_s17 }
  0x47   :  { %p3527_p5 = scmp.lt.u32.totalorder %s3523_s21, %s4216_s6 }
  0x49   :  { %p3529_p6 = pnand %p3527_p5, %p3524_p4 }
  0x4b   :  { %3532 = shalt.err (!%p3529_p6)
}
  0x4c   :  { %s3533_s24 = scalar_lea.vmem %s73_s17, 2048  ;;  %p3538_p8 = scmp.lt.s32.totalorder %s73_s17, %s73_s17 }
  0x4d   :  { %p3534_p7 = scmp.ne.s32.totalorder %s73_s17, %s3533_s24  ;;  %p3539_p9 = scmp.lt.s32.totalorder %s3533_s24, %s3533_s24 }
  0x4f   :  { %p3540_p10 = por %p3539_p9, %p3538_p8 }
  0x51   :  { %p3541_p11 = pnand %p3540_p10, %p3534_p7 }
  0x53   :  { %3544 = shalt.err (!%p3541_p11)
}
  0x54   :  { %78 = dma.hbm_to_vmem [thread:$0]  %s4216_s6, 2048, %s73_s17, [#allocation13], %s3579_s1, %s3579_s1, %s3580_s28  }
  0x55   :  { %3567 = dma.done.wait [#allocation7], 128  }
  0x56   :  { %3568 = vsyncadd [#allocation7], 4294967168 }
  0x57   :  { %3569 = dma.done.wait [#allocation10], 16384  }
  0x58   :  { %3570 = vsyncadd [#allocation10], 4294950912 }
  0x59   :  { %3571 = dma.done.wait [#allocation13], 4096  }
  0x5a   :  { %3572 = vsyncadd [#allocation13], 4294963200  ;;  %v3584_v0 = vmov 0.0   ;;  %v104_v1 = vld [vmem:[#allocation9 + $0x8] sm:$0xff]  ;;  %v106_v3 = vld [vmem:[#allocation9 + $0x18] sm:$0xff]  ;;  %vm3587_vm0 = vmmov 0  }
  0x5b   :  { %253 = vmatprep.mubr.f32.mxu0 %v3584_v0  ;;  %100 = vst [vmem:[#allocation2] sm:$0x1] %v3584_v0  ;;  %101 = vst [vmem:[#allocation3] sm:$0x1] %v3584_v0  ;;  %324 = vmatprep.mubr.f32.mxu1 %v3584_v0  ;;  %v108_v2 = vld [vmem:[#allocation9 + $0x28] sm:$0xff]  ;;  %v110_v5 = vld [vmem:[#allocation9 + $0x38] sm:$0xff] }
  0x5c   :  { %v2747_v4 = vpack.c.bf16 %v108_v2, %v104_v1  ;;  %v103_v6 = vld [vmem:[#allocation9] sm:$0xff]  ;;  %v2779_v8 = vpack.c.bf16 %v110_v5, %v106_v3  ;;  %v105_v10 = vld [vmem:[#allocation9 + $0x10] sm:$0xff]  ;;  %v112_v12 = vld [vmem:[#allocation9 + $0x48] sm:$0xff]  ;;  %s3588_s25 = smov [#allocation15]  }
  0x5d   :  { %v107_v7 = vld [vmem:[#allocation9 + $0x20] sm:$0xff]  ;;  %v109_v11 = vld [vmem:[#allocation9 + $0x30] sm:$0xff]  ;;  %v116_v14 = vld [vmem:[#allocation9 + $0x68] sm:$0xff]  ;;  %s2614_s26 = sshll.u32 %s3588_s25, 4  ;;  %s2615_s26 = int_to_ptr.vmem [resolvable:$true] %s2614_s26 }
  0x5e   :  { %v2749_v9 = vpack.c.bf16 %v107_v7, %v103_v6  ;;  %2748 = vmatprep.subr.bf16.mxu0 %v2747_v4  ;;  %v2781_v13 = vpack.c.bf16 %v109_v11, %v105_v10  ;;  %v114_v15 = vld [vmem:[#allocation9 + $0x58] sm:$0xff]  ;;  %2780 = vmatprep.subr.bf16.mxu1 %v2779_v8  ;;  %v2751_v17 = vpack.c.bf16 %v116_v14, %v112_v12  ;;  %v111_v19 = vld [vmem:[#allocation9 + $0x40] sm:$0xff]  ;;  %v113_v21 = vld [vmem:[#allocation9 + $0x50] sm:$0xff]  ;;  %s3545_s27 = scalar_lea.vmem %s2615_s26, 128  ;;  %p3550_p13 = scmp.lt.s32.totalorder %s2615_s26, %s2615_s26 }
  0x5f   :  { %v118_v16 = vld [vmem:[#allocation9 + $0x78] sm:$0xff]  ;;  %v115_v20 = vld [vmem:[#allocation9 + $0x60] sm:$0xff]  ;;  %v117_v23 = vld [vmem:[#allocation9 + $0x70] sm:$0xff]  ;;  %p3546_p12 = scmp.ne.s32.totalorder %s2615_s26, %s3545_s27  ;;  %p3551_p0 = scmp.lt.s32.totalorder %s3545_s27, %s3545_s27 }
  0x60   :  { %2750 = vmatpush1.bf16.msra.mxu0 %v2749_v9  ;;  %v2783_v18 = vpack.c.bf16 %v118_v16, %v114_v15  ;;  %2782 = vmatpush1.bf16.msra.mxu1 %v2781_v13  ;;  %v2753_v22 = vpack.c.bf16 %v115_v20, %v111_v19  ;;  %v120_v24 = vld [vmem:[#allocation9 + $0x88] sm:$0xff]  ;;  %v2785_v26 = vpack.c.bf16 %v117_v23, %v113_v21  ;;  %v122_v28 = vld [vmem:[#allocation9 + $0x98] sm:$0xff]  ;;  %v119_v30 = vld [vmem:[#allocation9 + $0x80] sm:$0xff] }
  0x61   :  { %v124_v25 = vld [vmem:[#allocation9 + $0xa8] sm:$0xff]  ;;  %2752 = vmatprep.subr.bf16.mxu0 %v2751_v17  ;;  %v126_v29 = vld [vmem:[#allocation9 + $0xb8] sm:$0xff]  ;;  %v123_v32 = vld [vmem:[#allocation9 + $0xa0] sm:$0xff]  ;;  %p3552_p1 = por %p3551_p0, %p3550_p13 }
  0x62   :  { %2784 = vmatprep.subr.bf16.mxu1 %v2783_v18  ;;  %v2755_v27 = vpack.c.bf16 %v124_v25, %v120_v24  ;;  %v2787_v31 = vpack.c.bf16 %v126_v29, %v122_v28  ;;  %v121_v33 = vld [vmem:[#allocation9 + $0x90] sm:$0xff]  ;;  %v2757_v35 = vpack.c.bf16 %v123_v32, %v119_v30  ;;  %v128_v36 = vld [vmem:[#allocation9 + $0xc8] sm:$0xff]  ;;  %v130_v38 = vld [vmem:[#allocation9 + $0xd8] sm:$0xff] }
  0x63   :  { %v125_v34 = vld [vmem:[#allocation9 + $0xb0] sm:$0xff]  ;;  %v132_v37 = vld [vmem:[#allocation9 + $0xe8] sm:$0xff]  ;;  %v134_v41 = vld [vmem:[#allocation9 + $0xf8] sm:$0xff]  ;;  %p3553_p2 = pnand %p3552_p1, %p3546_p12 }
  0x64   :  { %2754 = vmatpush1.bf16.msra.mxu0 %v2753_v22  ;;  %2786 = vmatpush1.bf16.msra.mxu1 %v2785_v26  ;;  %v2789_v39 = vpack.c.bf16 %v125_v34, %v121_v33  ;;  %v2759_v40 = vpack.c.bf16 %v132_v37, %v128_v36  ;;  %v127_v42 = vld [vmem:[#allocation9 + $0xc0] sm:$0xff]  ;;  %v2791_v44 = vpack.c.bf16 %v134_v41, %v130_v38  ;;  %v129_v45 = vld [vmem:[#allocation9 + $0xd0] sm:$0xff]  ;;  %v136_v47 = vld [vmem:[#allocation9 + $0x108] sm:$0xff] }
  0x65   :  { %2756 = vmatprep.subr.bf16.mxu0 %v2755_v27  ;;  %v131_v43 = vld [vmem:[#allocation9 + $0xe0] sm:$0xff]  ;;  %2788 = vmatprep.subr.bf16.mxu1 %v2787_v31  ;;  %v133_v46 = vld [vmem:[#allocation9 + $0xf0] sm:$0xff]  ;;  %v140_v48 = vld [vmem:[#allocation9 + $0x128] sm:$0xff] }
  0x66   :  { %v138_v49 = vld [vmem:[#allocation9 + $0x118] sm:$0xff]  ;;  %v2761_v51 = vpack.c.bf16 %v131_v43, %v127_v42  ;;  %v2793_v52 = vpack.c.bf16 %v133_v46, %v129_v45  ;;  %v2763_v53 = vpack.c.bf16 %v140_v48, %v136_v47  ;;  %v135_v54 = vld [vmem:[#allocation9 + $0x100] sm:$0xff]  ;;  %v137_v56 = vld [vmem:[#allocation9 + $0x110] sm:$0xff] }
  0x67   :  { %v142_v50 = vld [vmem:[#allocation9 + $0x138] sm:$0xff]  ;;  %v139_v55 = vld [vmem:[#allocation9 + $0x120] sm:$0xff]  ;;  %v141_v58 = vld [vmem:[#allocation9 + $0x130] sm:$0xff] }
  0x68   :  { %2758 = vmatpush1.bf16.msra.mxu0 %v2757_v35  ;;  %2790 = vmatpush1.bf16.msra.mxu1 %v2789_v39  ;;  %v2795_v57 = vpack.c.bf16 %v142_v50, %v138_v49  ;;  %v144_v59 = vld [vmem:[#allocation9 + $0x148] sm:$0xff]  ;;  %v146_v61 = vld [vmem:[#allocation9 + $0x158] sm:$0xff]  ;;  %v2765_v63 = vpack.c.bf16 %v139_v55, %v135_v54  ;;  %v2797_v1 = vpack.c.bf16 %v141_v58, %v137_v56  ;;  %v143_v3 = vld [vmem:[#allocation9 + $0x140] sm:$0xff] }
  0x69   :  { %2760 = vmatprep.subr.bf16.mxu0 %v2759_v40  ;;  %2792 = vmatprep.subr.bf16.mxu1 %v2791_v44  ;;  %v148_v60 = vld [vmem:[#allocation9 + $0x168] sm:$0xff]  ;;  %v150_v62 = vld [vmem:[#allocation9 + $0x178] sm:$0xff]  ;;  %v147_v4 = vld [vmem:[#allocation9 + $0x160] sm:$0xff] }
  0x6a   :  { %v2767_v2 = vpack.c.bf16 %v148_v60, %v144_v59  ;;  %v145_v5 = vld [vmem:[#allocation9 + $0x150] sm:$0xff]  ;;  %v2799_v6 = vpack.c.bf16 %v150_v62, %v146_v61  ;;  %v152_v8 = vld [vmem:[#allocation9 + $0x188] sm:$0xff]  ;;  %v154_v10 = vld [vmem:[#allocation9 + $0x198] sm:$0xff]  ;;  %v2769_v12 = vpack.c.bf16 %v147_v4, %v143_v3 }
  0x6b   :  { %v149_v7 = vld [vmem:[#allocation9 + $0x170] sm:$0xff]  ;;  %v156_v9 = vld [vmem:[#allocation9 + $0x1a8] sm:$0xff]  ;;  %v158_v11 = vld [vmem:[#allocation9 + $0x1b8] sm:$0xff] }
  0x6c   :  { %2762 = vmatpush1.bf16.msra.mxu0 %v2761_v51  ;;  %2794 = vmatpush1.bf16.msra.mxu1 %v2793_v52  ;;  %v2801_v13 = vpack.c.bf16 %v149_v7, %v145_v5  ;;  %v2771_v14 = vpack.c.bf16 %v156_v9, %v152_v8  ;;  %v151_v15 = vld [vmem:[#allocation9 + $0x180] sm:$0xff]  ;;  %v153_v17 = vld [vmem:[#allocation9 + $0x190] sm:$0xff]  ;;  %v2803_v18 = vpack.c.bf16 %v158_v11, %v154_v10  ;;  %v160_v20 = vld [vmem:[#allocation9 + $0x1c8] sm:$0xff] }
  0x6d   :  { %2764 = vmatprep.subr.bf16.mxu0 %v2763_v53  ;;  %2796 = vmatprep.subr.bf16.mxu1 %v2795_v57  ;;  %v155_v16 = vld [vmem:[#allocation9 + $0x1a0] sm:$0xff]  ;;  %v157_v19 = vld [vmem:[#allocation9 + $0x1b0] sm:$0xff]  ;;  %v164_v21 = vld [vmem:[#allocation9 + $0x1e8] sm:$0xff] }
  0x6e   :  { %v162_v22 = vld [vmem:[#allocation9 + $0x1d8] sm:$0xff]  ;;  %v2773_v24 = vpack.c.bf16 %v155_v16, %v151_v15  ;;  %v2805_v25 = vpack.c.bf16 %v157_v19, %v153_v17  ;;  %v2775_v26 = vpack.c.bf16 %v164_v21, %v160_v20  ;;  %v159_v27 = vld [vmem:[#allocation9 + $0x1c0] sm:$0xff]  ;;  %v161_v29 = vld [vmem:[#allocation9 + $0x1d0] sm:$0xff] }
  0x6f   :  { %v166_v23 = vld [vmem:[#allocation9 + $0x1f8] sm:$0xff]  ;;  %v163_v28 = vld [vmem:[#allocation9 + $0x1e0] sm:$0xff]  ;;  %v165_v31 = vld [vmem:[#allocation9 + $0x1f0] sm:$0xff] }
  0x70   :  { %2766 = vmatpush1.bf16.msra.mxu0 %v2765_v63  ;;  %2798 = vmatpush1.bf16.msra.mxu1 %v2797_v1  ;;  %v2807_v30 = vpack.c.bf16 %v166_v23, %v162_v22  ;;  %v339_v32 = vld [vmem:[#allocation11 + $0x8] sm:$0xff]  ;;  %v341_v34 = vld [vmem:[#allocation11 + $0x18] sm:$0xff]  ;;  %v2777_v36 = vpack.c.bf16 %v163_v28, %v159_v27  ;;  %v2809_v37 = vpack.c.bf16 %v165_v31, %v161_v29  ;;  %v338_v39 = vld [vmem:[#allocation11] sm:$0xff] }
  0x71   :  { %2768 = vmatprep.subr.bf16.mxu0 %v2767_v2  ;;  %2800 = vmatprep.subr.bf16.mxu1 %v2799_v6  ;;  %v343_v33 = vld [vmem:[#allocation11 + $0x28] sm:$0xff]  ;;  %v345_v35 = vld [vmem:[#allocation11 + $0x38] sm:$0xff]  ;;  %v342_v40 = vld [vmem:[#allocation11 + $0x20] sm:$0xff] }
  0x72   :  { %v3717_v38 = vpack.c.bf16 %v343_v33, %v339_v32  ;;  %v340_v41 = vld [vmem:[#allocation11 + $0x10] sm:$0xff]  ;;  %v3719_v42 = vpack.c.bf16 %v345_v35, %v341_v34  ;;  %v347_v44 = vld [vmem:[#allocation11 + $0x48] sm:$0xff]  ;;  %v349_v46 = vld [vmem:[#allocation11 + $0x58] sm:$0xff]  ;;  %v3721_v49 = vpack.c.bf16 %v342_v40, %v338_v39 }
  0x73   :  { %v344_v43 = vld [vmem:[#allocation11 + $0x30] sm:$0xff]  ;;  %v351_v45 = vld [vmem:[#allocation11 + $0x68] sm:$0xff]  ;;  %v353_v47 = vld [vmem:[#allocation11 + $0x78] sm:$0xff] }
  0x74   :  { %2770 = vmatpush1.bf16.msra.mxu0 %v2769_v12  ;;  %2802 = vmatpush1.bf16.msra.mxu1 %v2801_v13  ;;  %v102_v48 = vld [vmem:[#allocation6] sm:$0xff]  ;;  %v3724_v50 = vpack.c.bf16 %v344_v43, %v340_v41  ;;  %v3726_v51 = vpack.c.bf16 %v351_v45, %v347_v44  ;;  %v346_v52 = vld [vmem:[#allocation11 + $0x40] sm:$0xff]  ;;  %v348_v54 = vld [vmem:[#allocation11 + $0x50] sm:$0xff]  ;;  %v3729_v55 = vpack.c.bf16 %v353_v47, %v349_v46 }
  0x75   :  { %2772 = vmatprep.subr.bf16.mxu0 %v2771_v14  ;;  %2804 = vmatprep.subr.bf16.mxu1 %v2803_v18  ;;  %v350_v53 = vld [vmem:[#allocation11 + $0x60] sm:$0xff]  ;;  %v352_v56 = vld [vmem:[#allocation11 + $0x70] sm:$0xff]  ;;  %v355_v57 = vld [vmem:[#allocation11 + $0x88] sm:$0xff] }
  0x76   :  { %v359_v58 = vld [vmem:[#allocation11 + $0xa8] sm:$0xff]  ;;  %v357_v59 = vld [vmem:[#allocation11 + $0x98] sm:$0xff]  ;;  %v3732_v61 = vpack.c.bf16 %v350_v53, %v346_v52  ;;  %v3736_v62 = vpack.c.bf16 %v352_v56, %v348_v54  ;;  %v354_v1 = vld [vmem:[#allocation11 + $0x80] sm:$0xff] }
  0x77   :  { %v361_v60 = vld [vmem:[#allocation11 + $0xb8] sm:$0xff]  ;;  %v3738_v63 = vpack.c.bf16 %v359_v58, %v355_v57  ;;  %v358_v2 = vld [vmem:[#allocation11 + $0xa0] sm:$0xff]  ;;  %v356_v3 = vld [vmem:[#allocation11 + $0x90] sm:$0xff] }
  0x78   :  { %2774 = vmatpush1.bf16.msra.mxu0 %v2773_v24  ;;  %2806 = vmatpush1.bf16.msra.mxu1 %v2805_v25  ;;  %v3741_v4 = vpack.c.bf16 %v361_v60, %v357_v59  ;;  %v360_v5 = vld [vmem:[#allocation11 + $0xb0] sm:$0xff]  ;;  %v363_v6 = vld [vmem:[#allocation11 + $0xc8] sm:$0xff]  ;;  %v365_v8 = vld [vmem:[#allocation11 + $0xd8] sm:$0xff]  ;;  %v3746_v10 = vpack.c.bf16 %v358_v2, %v354_v1 }
  0x79   :  { %2776 = vmatprep.subr.bf16.mxu0 %v2775_v26  ;;  %2808 = vmatprep.subr.bf16.mxu1 %v2807_v30  ;;  %v367_v7 = vld [vmem:[#allocation11 + $0xe8] sm:$0xff]  ;;  %v369_v9 = vld [vmem:[#allocation11 + $0xf8] sm:$0xff]  ;;  %v3750_v11 = vpack.c.bf16 %v360_v5, %v356_v3  ;;  %v362_v13 = vld [vmem:[#allocation11 + $0xc0] sm:$0xff] }
  0x7a   :  { %v3752_v12 = vpack.c.bf16 %v367_v7, %v363_v6  ;;  %v366_v14 = vld [vmem:[#allocation11 + $0xe0] sm:$0xff]  ;;  %v364_v15 = vld [vmem:[#allocation11 + $0xd0] sm:$0xff]  ;;  %v3755_v16 = vpack.c.bf16 %v369_v9, %v365_v8  ;;  %v371_v18 = vld [vmem:[#allocation11 + $0x108] sm:$0xff] }
  0x7b   :  { %v368_v17 = vld [vmem:[#allocation11 + $0xf0] sm:$0xff]  ;;  %v375_v19 = vld [vmem:[#allocation11 + $0x128] sm:$0xff]  ;;  %v373_v20 = vld [vmem:[#allocation11 + $0x118] sm:$0xff]  ;;  %v3758_v22 = vpack.c.bf16 %v366_v14, %v362_v13 }
  0x7c   :  { %2778 = vmatpush1.bf16.msra.mxu0 %v2777_v36  ;;  %2810 = vmatpush1.bf16.msra.mxu1 %v2809_v37  ;;  %v377_v21 = vld [vmem:[#allocation11 + $0x138] sm:$0xff]  ;;  %v3762_v23 = vpack.c.bf16 %v368_v17, %v364_v15  ;;  %v3764_v24 = vpack.c.bf16 %v375_v19, %v371_v18  ;;  %v370_v25 = vld [vmem:[#allocation11 + $0x100] sm:$0xff]  ;;  %v372_v27 = vld [vmem:[#allocation11 + $0x110] sm:$0xff] }
  0x7d   :  { %2812 = vmatprep.subr.bf16.mxu0 %v3717_v38  ;;  %2844 = vmatprep.subr.bf16.mxu1 %v3719_v42  ;;  %v374_v26 = vld [vmem:[#allocation11 + $0x120] sm:$0xff]  ;;  %v3767_v28 = vpack.c.bf16 %v377_v21, %v373_v20  ;;  %v376_v29 = vld [vmem:[#allocation11 + $0x130] sm:$0xff]  ;;  %v379_v30 = vld [vmem:[#allocation11 + $0x148] sm:$0xff]  ;;  %v169_v20 = vlaneseq }
  0x7e   :  { %v383_v31 = vld [vmem:[#allocation11 + $0x168] sm:$0xff]  ;;  %v381_v32 = vld [vmem:[#allocation11 + $0x158] sm:$0xff]  ;;  %v3770_v34 = vpack.c.bf16 %v374_v26, %v370_v25  ;;  %v3774_v35 = vpack.c.bf16 %v376_v29, %v372_v27  ;;  %v378_v37 = vld [vmem:[#allocation11 + $0x140] sm:$0xff] }
  0x7f   :  { %254 = vmatmul.mubr.f32.vlgmr.msra.gmra.mrb[0].mxu0 %v102_v48  ;;  %325 = vmatmul.mubr.f32.vlgmr.msra.gmra.mrb[0].mxu1 %v102_v48  ;;  %v385_v33 = vld [vmem:[#allocation11 + $0x178] sm:$0xff]  ;;  %v3776_v36 = vpack.c.bf16 %v383_v31, %v379_v30  ;;  %v382_v39 = vld [vmem:[#allocation11 + $0x160] sm:$0xff]  ;;  %v380_v40 = vld [vmem:[#allocation11 + $0x150] sm:$0xff]  ;;  %v170_v21 = vshrl.u32 %v169_v20, 7 }
  0x80   :  { %2814 = vmatpush1.bf16.msra.mxu0 %v3721_v49  ;;  %2846 = vmatpush1.bf16.msra.mxu1 %v3724_v50  ;;  %v3779_v41 = vpack.c.bf16 %v385_v33, %v381_v32  ;;  %v384_v43 = vld [vmem:[#allocation11 + $0x170] sm:$0xff]  ;;  %v387_v44 = vld [vmem:[#allocation11 + $0x188] sm:$0xff]  ;;  %v389_v46 = vld [vmem:[#allocation11 + $0x198] sm:$0xff]  ;;  %v3782_v48 = vpack.c.bf16 %v382_v39, %v378_v37 }
  0x81   :  { %2816 = vmatprep.subr.bf16.mxu0 %v3726_v51  ;;  %2848 = vmatprep.subr.bf16.mxu1 %v3729_v55  ;;  %v391_v45 = vld [vmem:[#allocation11 + $0x1a8] sm:$0xff]  ;;  %v393_v47 = vld [vmem:[#allocation11 + $0x1b8] sm:$0xff]  ;;  %v3786_v52 = vpack.c.bf16 %v384_v43, %v380_v40  ;;  %v386_v54 = vld [vmem:[#allocation11 + $0x180] sm:$0xff]  ;;  %v171_v25 = vsub.s32 0, %v170_v21  ;;  %v179_v27 = vsub.s32 2, %v170_v21  ;;  %v175_v29 = vsub.s32 1, %v170_v21 }
  0x82   :  { %466 = vmatprep.mubr.f32.mxu0 %v3584_v0  ;;  %537 = vmatprep.mubr.f32.mxu1 %v3584_v0  ;;  %v3788_v53 = vpack.c.bf16 %v391_v45, %v387_v44  ;;  %v390_v56 = vld [vmem:[#allocation11 + $0x1a0] sm:$0xff]  ;;  %v388_v57 = vld [vmem:[#allocation11 + $0x190] sm:$0xff]  ;;  %v3791_v58 = vpack.c.bf16 %v393_v47, %v389_v46  ;;  %v395_v60 = vld [vmem:[#allocation11 + $0x1c8] sm:$0xff]  ;;  %v183_v30 = vsub.s32 3, %v170_v21 }
  0x83   :  { %v392_v59 = vld [vmem:[#allocation11 + $0x1b0] sm:$0xff]  ;;  %v399_v1 = vld [vmem:[#allocation11 + $0x1e8] sm:$0xff]  ;;  %v397_v2 = vld [vmem:[#allocation11 + $0x1d8] sm:$0xff]  ;;  %v3794_v5 = vpack.c.bf16 %v390_v56, %v386_v54  ;;  %v3585_v56 = vmov 1966171168  }
  0x84   :  { %2818 = vmatpush1.bf16.msra.mxu0 %v3732_v61  ;;  %2850 = vmatpush1.bf16.msra.mxu1 %v3736_v62  ;;  %v401_v3 = vld [vmem:[#allocation11 + $0x1f8] sm:$0xff]  ;;  %v3798_v6 = vpack.c.bf16 %v392_v59, %v388_v57  ;;  %v3800_v7 = vpack.c.bf16 %v399_v1, %v395_v60  ;;  %v394_v8 = vld [vmem:[#allocation11 + $0x1c0] sm:$0xff]  ;;  %v396_v14 = vld [vmem:[#allocation11 + $0x1d0] sm:$0xff]  ;;  %v551_v57 = vunpack.c.l.s4 %v3585_v56 }
  0x85   :  { %2820 = vmatprep.subr.bf16.mxu0 %v3738_v63  ;;  %2852 = vmatprep.subr.bf16.mxu1 %v3741_v4  ;;  %v398_v9 = vld [vmem:[#allocation11 + $0x1e0] sm:$0xff]  ;;  %v3803_v13 = vpack.c.bf16 %v401_v3, %v397_v2  ;;  %v400_v15 = vld [vmem:[#allocation11 + $0x1f0] sm:$0xff]  ;;  %v335_v19 = vld [vmem:[#allocation2] sm:$0x1] }
  0x86   :  { %v3806_v17 = vpack.c.bf16 %v398_v9, %v394_v8  ;;  %v3810_v18 = vpack.c.bf16 %v400_v15, %v396_v14  ;;  %v167_v26 = vld [vmem:[%s4213_s3] sm:$0xf]  ;;  %v552_v59 = vunpack.c.0.s8 %v551_v57 }
  0x87   :  { %v172_v31 = vrot.slane %v167_v26, %v171_v25  ;;  %v180_v32 = vrot.slane %v167_v26, %v179_v27  ;;  %v176_v33 = vrot.slane %v167_v26, %v175_v29  ;;  %v184_v37 = vrot.slane %v167_v26, %v183_v30 }
  0x88   :  { %2822 = vmatpush1.bf16.msra.mxu0 %v3746_v10  ;;  %2854 = vmatpush1.bf16.msra.mxu1 %v3750_v11  ;;  %v3854_v60 = vsub.s32 %v552_v59, %v170_v21 }
  0x89   :  { %2824 = vmatprep.subr.bf16.mxu0 %v3752_v12  ;;  %2856 = vmatprep.subr.bf16.mxu1 %v3755_v16 }
  0x8c   :  { %2826 = vmatpush1.bf16.msra.mxu0 %v3758_v22  ;;  %2858 = vmatpush1.bf16.msra.mxu1 %v3762_v23 }
  0x8d   :  { %2828 = vmatprep.subr.bf16.mxu0 %v3764_v24  ;;  %2860 = vmatprep.subr.bf16.mxu1 %v3767_v28 }
  0x90   :  { %2830 = vmatpush1.bf16.msra.mxu0 %v3770_v34  ;;  %2862 = vmatpush1.bf16.msra.mxu1 %v3774_v35 }
  0x91   :  { %2832 = vmatprep.subr.bf16.mxu0 %v3776_v36  ;;  %2864 = vmatprep.subr.bf16.mxu1 %v3779_v41 }
  0x94   :  { %2834 = vmatpush1.bf16.msra.mxu0 %v3782_v48  ;;  %2866 = vmatpush1.bf16.msra.mxu1 %v3786_v52 }
  0x95   :  { %2836 = vmatprep.subr.bf16.mxu0 %v3788_v53  ;;  %2868 = vmatprep.subr.bf16.mxu1 %v3791_v58 }
  0x98   :  { %2838 = vmatpush1.bf16.msra.mxu0 %v3794_v5  ;;  %2870 = vmatpush1.bf16.msra.mxu1 %v3798_v6 }
  0x99   :  { %2840 = vmatprep.subr.bf16.mxu0 %v3800_v7  ;;  %2872 = vmatprep.subr.bf16.mxu1 %v3803_v13 }
  0x9c   :  { %2842 = vmatpush1.bf16.msra.mxu0 %v3806_v17  ;;  %2874 = vmatpush1.bf16.msra.mxu1 %v3810_v18 }
  0x9d   :  { %2876 = vmatprep.subr.bf16.mxu0 %v3717_v38  ;;  %2908 = vmatprep.subr.bf16.mxu1 %v3719_v42 }
  0x9f   :  { %467 = vmatmul.mubr.f32.vlgmr.msra.gmra.mrb[2].mxu0 %v335_v19  ;;  %538 = vmatmul.mubr.f32.vlgmr.msra.gmra.mrb[2].mxu1 %v335_v19 }
  0xa0   :  { %2878 = vmatpush1.bf16.msra.mxu0 %v3721_v49  ;;  %2910 = vmatpush1.bf16.msra.mxu1 %v3724_v50 }
  0xa1   :  { %2880 = vmatprep.subr.bf16.mxu0 %v3726_v51  ;;  %2912 = vmatprep.subr.bf16.mxu1 %v3729_v55 }
  0xa2   :  { %726 = vmatprep.mubr.f32.mxu0 %v3584_v0  ;;  %797 = vmatprep.mubr.f32.mxu1 %v3584_v0 }
  0xa4   :  { %2882 = vmatpush1.bf16.msra.mxu0 %v3732_v61  ;;  %2914 = vmatpush1.bf16.msra.mxu1 %v3736_v62 }
  0xa5   :  { %2884 = vmatprep.subr.bf16.mxu0 %v3738_v63  ;;  %2916 = vmatprep.subr.bf16.mxu1 %v3741_v4 }
  0xa8   :  { %2886 = vmatpush1.bf16.msra.mxu0 %v3746_v10  ;;  %2918 = vmatpush1.bf16.msra.mxu1 %v3750_v11 }
  0xa9   :  { %2888 = vmatprep.subr.bf16.mxu0 %v3752_v12  ;;  %2920 = vmatprep.subr.bf16.mxu1 %v3755_v16 }
  0xac   :  { %2890 = vmatpush1.bf16.msra.mxu0 %v3758_v22  ;;  %2922 = vmatpush1.bf16.msra.mxu1 %v3762_v23 }
  0xad   :  { %2892 = vmatprep.subr.bf16.mxu0 %v3764_v24  ;;  %2924 = vmatprep.subr.bf16.mxu1 %v3767_v28 }
  0xb0   :  { %2894 = vmatpush1.bf16.msra.mxu0 %v3770_v34  ;;  %2926 = vmatpush1.bf16.msra.mxu1 %v3774_v35 }
  0xb1   :  { %2896 = vmatprep.subr.bf16.mxu0 %v3776_v36  ;;  %2928 = vmatprep.subr.bf16.mxu1 %v3779_v41 }
  0xb4   :  { %2898 = vmatpush1.bf16.msra.mxu0 %v3782_v48  ;;  %2930 = vmatpush1.bf16.msra.mxu1 %v3786_v52 }
  0xb5   :  { %2900 = vmatprep.subr.bf16.mxu0 %v3788_v53  ;;  %2932 = vmatprep.subr.bf16.mxu1 %v3791_v58 }
  0xb8   :  { %2902 = vmatpush1.bf16.msra.mxu0 %v3794_v5  ;;  %2934 = vmatpush1.bf16.msra.mxu1 %v3798_v6 }
  0xb9   :  { %2904 = vmatprep.subr.bf16.mxu0 %v3800_v7  ;;  %2936 = vmatprep.subr.bf16.mxu1 %v3803_v13 }
  0xbc   :  { %2906 = vmatpush1.bf16.msra.mxu0 %v3806_v17  ;;  %2938 = vmatpush1.bf16.msra.mxu1 %v3810_v18 }
  0xbd   :  { %2940 = vmatprep.subr.bf16.mxu0 %v3717_v38  ;;  %2972 = vmatprep.subr.bf16.mxu1 %v3719_v42 }
 0x152   :  { %v255_v39 = vpop.f32.mrb[0].mxu0  ;;  %v326_v43 = vpop.f32.mrb[0].mxu1 }
 0x153   :  { %v256_v40 = vadd.f32 %v255_v39, %v172_v31  ;;  %v257_v44 = vpop.f32.mrb[1].mxu0  ;;  %v327_v45 = vadd.f32 %v326_v43, %v180_v32  ;;  %v328_v47 = vpop.f32.mrb[1].mxu1  ;;  %v336_v39 = vld [vmem:[#allocation3] sm:$0x1] }
 0x154   :  { %v258_v46 = vadd.f32 %v257_v44, %v176_v33  ;;  %v329_v54 = vadd.f32 %v328_v47, %v184_v37 }
 0x155   :  { %331 = vst [vmem:[#allocation4] sm:$0xff] %v256_v40  ;;  %333 = vst [vmem:[#allocation4 + $0x10] sm:$0xff] %v327_v45 }
 0x156   :  { %332 = vst [vmem:[#allocation4 + $0x8] sm:$0xff] %v258_v46  ;;  %334 = vst [vmem:[#allocation4 + $0x18] sm:$0xff] %v329_v54 }
 0x15d   :  { %v337_v26 = vld [vmem:[#allocation4] ss:$8 sm:$0xf] }
 0x172   :  { %v468_v1 = vpop.f32.mrb[2].mxu0  ;;  %v539_v2 = vpop.f32.mrb[2].mxu1 }
 0x173   :  { %v470_v3 = vpop.f32.mrb[3].mxu0  ;;  %v541_v9 = vpop.f32.mrb[3].mxu1 }
 0x174   :  { %v548_v8 = vcombine.low %v468_v1, %v470_v3  ;;  %v549_v14 = vcombine.low %v539_v2, %v541_v9 }
 0x176   :  { %v556_v15 = vrot.slane %v548_v8, %v3854_v60  ;;  %v563_v19 = vrot.slane %v549_v14, %v3854_v60 }
 0x178   :  { %v564_v20 = vcombine.low %v556_v15, %v563_v19 }
 0x17a   :  { %v571_v25 = vrot.slane %v564_v20, %v3854_v60  ;;  %v597_v20 = vld [vmem:[#allocation4 + $0x1] ss:$8 sm:$0xf] }
 0x17c   :  { %v573_v27 = vadd.f32 %v571_v25, %v337_v26 }
 0x17e   :  { %v2625_v29 = vmul.f32 -1.442695, %v573_v27 }
 0x180   :  { %3385 = vpow2.f32 %v2625_v29 }
 0x18a   :  { %v3386_v30 = vpop.eup %3385 }
 0x18b   :  { %v577_v21 = vadd.f32 1.0, %v3386_v30 }
 0x18d   :  { %3387 = vrcp.f32 %v577_v21 }
 0x197   :  { %v3388_v31 = vpop.eup %3387 }
 0x198   :  { %v581_v32 = vrot.slane %v3388_v31, 2  ;;  %v585_v37 = vrot.slane %v3388_v31, 1  ;;  %v591_v46 = vrot.slane %v3388_v31, 3 }
 0x19a   :  { %v583_v33 = vmul.f32 2.0, %v581_v32  ;;  %v587_v43 = vmul.f32 %v585_v37, %v336_v39 }
 0x19c   :  { %v2626_v40 = vadd.f32 -1.0, %v583_v33 }
 0x19e   :  { %v588_v44 = vmul.f32 %v3388_v31, %v2626_v40 }
 0x1a0   :  { %v3859_v45 = vadd.f32 %v588_v44, %v587_v43 }
 0x1a2   :  { %3389 = vtanh.f32 %v3859_v45 }
 0x1ac   :  { %v3390_v47 = vpop.eup %3389 }
 0x1ad   :  { %v593_v54 = vmul.f32 %v3390_v47, %v591_v46  ;;  %v1385_v46 = vld [vmem:[#allocation11 + $0x38] sm:$0xff]  ;;  %v1378_v47 = vld [vmem:[#allocation11] sm:$0xff] }
 0x1af   :  { %v594_v56 = vmax.f32 %v593_v54, 0.0  ;;  %727 = vmatmul.mubr.f32.vlgmr.msra.gmra.mrb[4].mxu0 %v593_v54  ;;  %798 = vmatmul.mubr.f32.vlgmr.msra.gmra.mrb[4].mxu1 %v593_v54  ;;  %v1382_v54 = vld [vmem:[#allocation11 + $0x20] sm:$0xff] }
 0x1b0   :  { %2942 = vmatpush1.bf16.msra.mxu0 %v3721_v49  ;;  %2974 = vmatpush1.bf16.msra.mxu1 %v3724_v50 }
 0x1b1   :  { %595 = vst [vmem:[#allocation5] sm:$0x1] %v594_v56  ;;  %2944 = vmatprep.subr.bf16.mxu0 %v3726_v51  ;;  %2976 = vmatprep.subr.bf16.mxu1 %v3729_v55 }
 0x1b2   :  { %986 = vmatprep.mubr.f32.mxu0 %v3584_v0  ;;  %1057 = vmatprep.mubr.f32.mxu1 %v3584_v0 }
 0x1b4   :  { %2946 = vmatpush1.bf16.msra.mxu0 %v3732_v61  ;;  %2978 = vmatpush1.bf16.msra.mxu1 %v3736_v62 }
 0x1b5   :  { %2948 = vmatprep.subr.bf16.mxu0 %v3738_v63  ;;  %2980 = vmatprep.subr.bf16.mxu1 %v3741_v4 }
 0x1b8   :  { %2950 = vmatpush1.bf16.msra.mxu0 %v3746_v10  ;;  %2982 = vmatpush1.bf16.msra.mxu1 %v3750_v11 }
 0x1b9   :  { %2952 = vmatprep.subr.bf16.mxu0 %v3752_v12  ;;  %2984 = vmatprep.subr.bf16.mxu1 %v3755_v16 }
 0x1bc   :  { %2954 = vmatpush1.bf16.msra.mxu0 %v3758_v22  ;;  %2986 = vmatpush1.bf16.msra.mxu1 %v3762_v23 }
 0x1bd   :  { %2956 = vmatprep.subr.bf16.mxu0 %v3764_v24  ;;  %2988 = vmatprep.subr.bf16.mxu1 %v3767_v28 }
 0x1c0   :  { %2958 = vmatpush1.bf16.msra.mxu0 %v3770_v34  ;;  %2990 = vmatpush1.bf16.msra.mxu1 %v3774_v35 }
 0x1c1   :  { %2960 = vmatprep.subr.bf16.mxu0 %v3776_v36  ;;  %2992 = vmatprep.subr.bf16.mxu1 %v3779_v41 }
 0x1c4   :  { %2962 = vmatpush1.bf16.msra.mxu0 %v3782_v48  ;;  %2994 = vmatpush1.bf16.msra.mxu1 %v3786_v52 }
 0x1c5   :  { %2964 = vmatprep.subr.bf16.mxu0 %v3788_v53  ;;  %2996 = vmatprep.subr.bf16.mxu1 %v3791_v58 }
 0x1c8   :  { %2966 = vmatpush1.bf16.msra.mxu0 %v3794_v5  ;;  %2998 = vmatpush1.bf16.msra.mxu1 %v3798_v6 }
 0x1c9   :  { %2968 = vmatprep.subr.bf16.mxu0 %v3800_v7  ;;  %3000 = vmatprep.subr.bf16.mxu1 %v3803_v13 }
 0x1cc   :  { %2970 = vmatpush1.bf16.msra.mxu0 %v3806_v17  ;;  %3002 = vmatpush1.bf16.msra.mxu1 %v3810_v18 }
 0x1cd   :  { %3004 = vmatprep.subr.bf16.mxu0 %v3717_v38  ;;  %3036 = vmatprep.subr.bf16.mxu1 %v3719_v42 }
 0x282   :  { %v728_v57 = vpop.f32.mrb[4].mxu0  ;;  %v799_v59 = vpop.f32.mrb[4].mxu1 }
 0x283   :  { %v730_v1 = vpop.f32.mrb[5].mxu0  ;;  %v801_v2 = vpop.f32.mrb[5].mxu1 }
 0x284   :  { %v808_v3 = vcombine.low %v728_v57, %v730_v1  ;;  %v809_v8 = vcombine.low %v799_v59, %v801_v2  ;;  %v3948_v57 = vpack.c.bf16 %v1382_v54, %v1378_v47  ;;  %v1380_v59 = vld [vmem:[#allocation11 + $0x10] sm:$0xff]  ;;  %v1387_v2 = vld [vmem:[#allocation11 + $0x48] sm:$0xff]  ;;  %v1418_v47 = vld [vmem:[#allocation11 + $0x140] sm:$0xff] }
 0x285   :  { %v1384_v1 = vld [vmem:[#allocation11 + $0x30] sm:$0xff]  ;;  %v1422_v54 = vld [vmem:[#allocation11 + $0x160] sm:$0xff] }
 0x286   :  { %v816_v9 = vrot.slane %v808_v3, %v3854_v60  ;;  %v823_v14 = vrot.slane %v809_v8, %v3854_v60  ;;  %v3951_v3 = vpack.c.bf16 %v1384_v1, %v1380_v59  ;;  %v1391_v8 = vld [vmem:[#allocation11 + $0x68] sm:$0xff]  ;;  %v1420_v59 = vld [vmem:[#allocation11 + $0x150] sm:$0xff] }
 0x288   :  { %v824_v15 = vcombine.low %v816_v9, %v823_v14  ;;  %v1389_v9 = vld [vmem:[#allocation11 + $0x58] sm:$0xff] }
 0x289   :  { %v1393_v14 = vld [vmem:[#allocation11 + $0x78] sm:$0xff] }
 0x28a   :  { %v831_v19 = vrot.slane %v824_v15, %v3854_v60  ;;  %v3955_v15 = vpack.c.bf16 %v1391_v8, %v1387_v2  ;;  %v1424_v2 = vld [vmem:[#allocation11 + $0x170] sm:$0xff]  ;;  %v1427_v8 = vld [vmem:[#allocation11 + $0x188] sm:$0xff] }
 0x28c   :  { %v833_v25 = vadd.f32 %v831_v19, %v597_v20  ;;  %v3957_v19 = vpack.c.bf16 %v1393_v14, %v1389_v9  ;;  %v1386_v20 = vld [vmem:[#allocation11 + $0x40] sm:$0xff]  ;;  %v1431_v9 = vld [vmem:[#allocation11 + $0x1a8] sm:$0xff]  ;;  %v1429_v14 = vld [vmem:[#allocation11 + $0x198] sm:$0xff] }
 0x28e   :  { %v2627_v26 = vmul.f32 -1.442695, %v833_v25  ;;  %v1390_v25 = vld [vmem:[#allocation11 + $0x60] sm:$0xff] }
 0x290   :  { %3391 = vpow2.f32 %v2627_v26  ;;  %v1388_v26 = vld [vmem:[#allocation11 + $0x50] sm:$0xff] }
 0x29a   :  { %v3392_v38 = vpop.eup %3391 }
 0x29b   :  { %v837_v27 = vadd.f32 1.0, %v3392_v38  ;;  %v3960_v38 = vpack.c.bf16 %v1390_v25, %v1386_v20  ;;  %v1433_v20 = vld [vmem:[#allocation11 + $0x1b8] sm:$0xff]  ;;  %v4007_v25 = vpack.c.bf16 %v1422_v54, %v1418_v47 }
 0x29c   :  { %v1117_v54 = vld [vmem:[#allocation4 + $0x3] ss:$8 sm:$0xf] }
 0x29d   :  { %3393 = vrcp.f32 %v837_v27  ;;  %v1392_v27 = vld [vmem:[#allocation11 + $0x70] sm:$0xff] }
 0x2a7   :  { %v3394_v42 = vpop.eup %3393 }
 0x2a8   :  { %v841_v29 = vrot.slane %v3394_v42, 2  ;;  %v845_v21 = vrot.slane %v3394_v42, 1  ;;  %v851_v39 = vrot.slane %v3394_v42, 3 }
 0x2aa   :  { %v843_v30 = vmul.f32 2.0, %v841_v29  ;;  %v847_v32 = vmul.f32 %v845_v21, %v3859_v45  ;;  %v1399_v29 = vld [vmem:[#allocation11 + $0xa8] sm:$0xff] }
 0x2ac   :  { %v2628_v31 = vadd.f32 -1.0, %v843_v30  ;;  %v3964_v30 = vpack.c.bf16 %v1392_v27, %v1388_v26  ;;  %v4011_v26 = vpack.c.bf16 %v1424_v2, %v1420_v59  ;;  %v4013_v27 = vpack.c.bf16 %v1431_v9, %v1427_v8 }
 0x2ae   :  { %v848_v33 = vmul.f32 %v3394_v42, %v2628_v31  ;;  %v1395_v42 = vld [vmem:[#allocation11 + $0x88] sm:$0xff]  ;;  %v1397_v31 = vld [vmem:[#allocation11 + $0x98] sm:$0xff] }
 0x2af   :  { %v3966_v21 = vpack.c.bf16 %v1399_v29, %v1395_v42  ;;  %v1426_v42 = vld [vmem:[#allocation11 + $0x180] sm:$0xff] }
 0x2b0   :  { %v3900_v37 = vadd.f32 %v848_v33, %v847_v32  ;;  %v1401_v32 = vld [vmem:[#allocation11 + $0xb8] sm:$0xff]  ;;  %v1394_v33 = vld [vmem:[#allocation11 + $0x80] sm:$0xff] }
 0x2b1   :  { %v1430_v29 = vld [vmem:[#allocation11 + $0x1a0] sm:$0xff] }
 0x2b2   :  { %3395 = vtanh.f32 %v3900_v37 }
 0x2bc   :  { %v3396_v40 = vpop.eup %3395 }
 0x2bd   :  { %v853_v43 = vmul.f32 %v3396_v40, %v851_v39  ;;  %v1398_v39 = vld [vmem:[#allocation11 + $0xa0] sm:$0xff]  ;;  %v1396_v40 = vld [vmem:[#allocation11 + $0x90] sm:$0xff] }
 0x2bf   :  { %v854_v44 = vmax.f32 %v853_v43, 0.0  ;;  %987 = vmatmul.mubr.f32.vlgmr.msra.gmra.mrb[6].mxu0 %v853_v43  ;;  %1058 = vmatmul.mubr.f32.vlgmr.msra.gmra.mrb[6].mxu1 %v853_v43  ;;  %v1400_v43 = vld [vmem:[#allocation11 + $0xb0] sm:$0xff] }
 0x2c0   :  { %3006 = vmatpush1.bf16.msra.mxu0 %v3721_v49  ;;  %3038 = vmatpush1.bf16.msra.mxu1 %v3724_v50 }
 0x2c1   :  { %855 = vst [vmem:[#allocation5 + $0x1] sm:$0x1] %v854_v44  ;;  %3008 = vmatprep.subr.bf16.mxu0 %v3726_v51  ;;  %3040 = vmatprep.subr.bf16.mxu1 %v3729_v55  ;;  %v3971_v44 = vpack.c.bf16 %v1398_v39, %v1394_v33  ;;  %v1432_v33 = vld [vmem:[#allocation11 + $0x1b0] sm:$0xff]  ;;  %v1435_v39 = vld [vmem:[#allocation11 + $0x1c8] sm:$0xff] }
 0x2c2   :  { %1246 = vmatprep.mubr.f32.mxu0 %v3584_v0  ;;  %1317 = vmatprep.mubr.f32.mxu1 %v3584_v0 }
 0x2c4   :  { %3010 = vmatpush1.bf16.msra.mxu0 %v3732_v61  ;;  %3042 = vmatpush1.bf16.msra.mxu1 %v3736_v62 }
 0x2c5   :  { %3012 = vmatprep.subr.bf16.mxu0 %v3738_v63  ;;  %3044 = vmatprep.subr.bf16.mxu1 %v3741_v4 }
 0x2c8   :  { %3014 = vmatpush1.bf16.msra.mxu0 %v3746_v10  ;;  %3046 = vmatpush1.bf16.msra.mxu1 %v3750_v11 }
 0x2c9   :  { %3016 = vmatprep.subr.bf16.mxu0 %v3752_v12  ;;  %3048 = vmatprep.subr.bf16.mxu1 %v3755_v16  ;;  %v857_v12 = vld [vmem:[#allocation4 + $0x2] ss:$8 sm:$0xf] }
 0x2cc   :  { %3018 = vmatpush1.bf16.msra.mxu0 %v3758_v22  ;;  %3050 = vmatpush1.bf16.msra.mxu1 %v3762_v23 }
 0x2cd   :  { %3020 = vmatprep.subr.bf16.mxu0 %v3764_v24  ;;  %3052 = vmatprep.subr.bf16.mxu1 %v3767_v28 }
 0x2d0   :  { %3022 = vmatpush1.bf16.msra.mxu0 %v3770_v34  ;;  %3054 = vmatpush1.bf16.msra.mxu1 %v3774_v35 }
 0x2d1   :  { %3024 = vmatprep.subr.bf16.mxu0 %v3776_v36  ;;  %3056 = vmatprep.subr.bf16.mxu1 %v3779_v41 }
 0x2d4   :  { %3026 = vmatpush1.bf16.msra.mxu0 %v3782_v48  ;;  %3058 = vmatpush1.bf16.msra.mxu1 %v3786_v52 }
 0x2d5   :  { %3028 = vmatprep.subr.bf16.mxu0 %v3788_v53  ;;  %3060 = vmatprep.subr.bf16.mxu1 %v3791_v58 }
 0x2d8   :  { %3030 = vmatpush1.bf16.msra.mxu0 %v3794_v5  ;;  %3062 = vmatpush1.bf16.msra.mxu1 %v3798_v6 }
 0x2d9   :  { %3032 = vmatprep.subr.bf16.mxu0 %v3800_v7  ;;  %3064 = vmatprep.subr.bf16.mxu1 %v3803_v13  ;;  %v1379_v13 = vld [vmem:[#allocation11 + $0x8] sm:$0xff] }
 0x2dc   :  { %3034 = vmatpush1.bf16.msra.mxu0 %v3806_v17  ;;  %3066 = vmatpush1.bf16.msra.mxu1 %v3810_v18  ;;  %v1383_v17 = vld [vmem:[#allocation11 + $0x28] sm:$0xff]  ;;  %v1381_v18 = vld [vmem:[#allocation11 + $0x18] sm:$0xff] }
 0x2dd   :  { %v3944_v45 = vpack.c.bf16 %v1383_v17, %v1379_v13  ;;  %v3946_v56 = vpack.c.bf16 %v1385_v46, %v1381_v18  ;;  %v1425_v13 = vld [vmem:[#allocation11 + $0x178] sm:$0xff] }
 0x2df   :  { %3068 = vmatprep.subr.bf16.mxu0 %v3944_v45  ;;  %3100 = vmatprep.subr.bf16.mxu1 %v3946_v56 }
 0x392   :  { %v988_v49 = vpop.f32.mrb[6].mxu0  ;;  %v1059_v50 = vpop.f32.mrb[6].mxu1 }
 0x393   :  { %v990_v51 = vpop.f32.mrb[7].mxu0  ;;  %v1061_v55 = vpop.f32.mrb[7].mxu1 }
 0x394   :  { %v1068_v61 = vcombine.low %v988_v49, %v990_v51  ;;  %v1069_v62 = vcombine.low %v1059_v50, %v1061_v55  ;;  %v1403_v49 = vld [vmem:[#allocation11 + $0xc8] sm:$0xff]  ;;  %v1405_v51 = vld [vmem:[#allocation11 + $0xd8] sm:$0xff]  ;;  %v3975_v55 = vpack.c.bf16 %v1400_v43, %v1396_v40 }
 0x395   :  { %v1407_v50 = vld [vmem:[#allocation11 + $0xe8] sm:$0xff]  ;;  %v1437_v43 = vld [vmem:[#allocation11 + $0x1d8] sm:$0xff] }
 0x396   :  { %v1076_v63 = vrot.slane %v1068_v61, %v3854_v60  ;;  %v1083_v4 = vrot.slane %v1069_v62, %v3854_v60  ;;  %v3977_v61 = vpack.c.bf16 %v1407_v50, %v1403_v49  ;;  %v1409_v62 = vld [vmem:[#allocation11 + $0xf8] sm:$0xff]  ;;  %v1439_v40 = vld [vmem:[#allocation11 + $0x1e8] sm:$0xff]  ;;  %v4019_v50 = vpack.c.bf16 %v1430_v29, %v1426_v42 }
 0x397   :  { %v1441_v49 = vld [vmem:[#allocation11 + $0x1f8] sm:$0xff] }
 0x398   :  { %v1084_v10 = vcombine.low %v1076_v63, %v1083_v4  ;;  %v1402_v63 = vld [vmem:[#allocation11 + $0xc0] sm:$0xff] }
 0x399   :  { %v1406_v4 = vld [vmem:[#allocation11 + $0xe0] sm:$0xff] }
 0x39a   :  { %v1091_v11 = vrot.slane %v1084_v10, %v3854_v60  ;;  %v3980_v10 = vpack.c.bf16 %v1409_v62, %v1405_v51  ;;  %v4025_v62 = vpack.c.bf16 %v1439_v40, %v1435_v39 }
 0x39c   :  { %v1093_v16 = vadd.f32 %v1091_v11, %v857_v12  ;;  %v1404_v11 = vld [vmem:[#allocation11 + $0xd0] sm:$0xff] }
 0x39d   :  { %v1408_v12 = vld [vmem:[#allocation11 + $0xf0] sm:$0xff] }
 0x39e   :  { %v2629_v22 = vmul.f32 -1.442695, %v1093_v16  ;;  %v1411_v16 = vld [vmem:[#allocation11 + $0x108] sm:$0xff] }
 0x3a0   :  { %3397 = vpow2.f32 %v2629_v22  ;;  %v1415_v22 = vld [vmem:[#allocation11 + $0x128] sm:$0xff] }
 0x3aa   :  { %v3398_v23 = vpop.eup %3397 }
 0x3ab   :  { %v1097_v24 = vadd.f32 1.0, %v3398_v23  ;;  %v1413_v23 = vld [vmem:[#allocation11 + $0x118] sm:$0xff] }
 0x3ad   :  { %3399 = vrcp.f32 %v1097_v24  ;;  %v1417_v24 = vld [vmem:[#allocation11 + $0x138] sm:$0xff] }
 0x3b7   :  { %v3400_v28 = vpop.eup %3399 }
 0x3b8   :  { %v1101_v34 = vrot.slane %v3400_v28, 2  ;;  %v1105_v36 = vrot.slane %v3400_v28, 1  ;;  %v1111_v58 = vrot.slane %v3400_v28, 3 }
 0x3ba   :  { %v1103_v35 = vmul.f32 2.0, %v1101_v34  ;;  %v1107_v48 = vmul.f32 %v1105_v36, %v3900_v37  ;;  %v3968_v37 = vpack.c.bf16 %v1401_v32, %v1397_v31  ;;  %v3987_v34 = vpack.c.bf16 %v1408_v12, %v1404_v11  ;;  %v1410_v36 = vld [vmem:[#allocation11 + $0x100] sm:$0xff]  ;;  %v1428_v31 = vld [vmem:[#allocation11 + $0x190] sm:$0xff] }
 0x3bb   :  { %v4016_v32 = vpack.c.bf16 %v1433_v20, %v1429_v14  ;;  %v4023_v51 = vpack.c.bf16 %v1432_v33, %v1428_v31  ;;  %v4028_v11 = vpack.c.bf16 %v1441_v49, %v1437_v43  ;;  %v1436_v12 = vld [vmem:[#allocation11 + $0x1d0] sm:$0xff] }
 0x3bc   :  { %v2630_v41 = vadd.f32 -1.0, %v1103_v35  ;;  %v3989_v35 = vpack.c.bf16 %v1415_v22, %v1411_v16  ;;  %v1440_v16 = vld [vmem:[#allocation11 + $0x1f0] sm:$0xff] }
 0x3be   :  { %v1108_v52 = vmul.f32 %v3400_v28, %v2630_v41  ;;  %v3983_v28 = vpack.c.bf16 %v1406_v4, %v1402_v63  ;;  %v1414_v41 = vld [vmem:[#allocation11 + $0x120] sm:$0xff] }
 0x3bf   :  { %v3995_v17 = vpack.c.bf16 %v1414_v41, %v1410_v36  ;;  %v1434_v63 = vld [vmem:[#allocation11 + $0x1c0] sm:$0xff] }
 0x3c0   :  { %v3939_v53 = vadd.f32 %v1108_v52, %v1107_v48  ;;  %v1412_v48 = vld [vmem:[#allocation11 + $0x110] sm:$0xff]  ;;  %v3992_v52 = vpack.c.bf16 %v1417_v24, %v1413_v23  ;;  %v1438_v4 = vld [vmem:[#allocation11 + $0x1e0] sm:$0xff]  ;;  %v4035_v23 = vpack.c.bf16 %v1440_v16, %v1436_v12 }
 0x3c1   :  { %v4031_v22 = vpack.c.bf16 %v1438_v4, %v1434_v63 }
 0x3c2   :  { %3401 = vtanh.f32 %v3939_v53 }
 0x3cc   :  { %v3402_v5 = vpop.eup %3401 }
 0x3cd   :  { %v1113_v6 = vmul.f32 %v3402_v5, %v1111_v58  ;;  %v1416_v58 = vld [vmem:[#allocation11 + $0x130] sm:$0xff]  ;;  %v1419_v5 = vld [vmem:[#allocation11 + $0x148] sm:$0xff] }
 0x3ce   :  { %v3999_v18 = vpack.c.bf16 %v1416_v58, %v1412_v48 }
 0x3cf   :  { %v1114_v7 = vmax.f32 %v1113_v6, 0.0  ;;  %1247 = vmatmul.mubr.f32.vlgmr.msra.gmra.mrb[8].mxu0 %v1113_v6  ;;  %1318 = vmatmul.mubr.f32.vlgmr.msra.gmra.mrb[8].mxu1 %v1113_v6  ;;  %v1423_v6 = vld [vmem:[#allocation11 + $0x168] sm:$0xff] }
 0x3d0   :  { %1506 = vmatprep.mubr.f32.mxu0 %v3584_v0  ;;  %1577 = vmatprep.mubr.f32.mxu1 %v3584_v0  ;;  %v4001_v46 = vpack.c.bf16 %v1423_v6, %v1419_v5 }
 0x3d1   :  { %1115 = vst [vmem:[#allocation5 + $0x2] sm:$0x1] %v1114_v7  ;;  %3070 = vmatpush1.bf16.msra.mxu0 %v3948_v57  ;;  %3102 = vmatpush1.bf16.msra.mxu1 %v3951_v3  ;;  %v1421_v7 = vld [vmem:[#allocation11 + $0x158] sm:$0xff] }
 0x3d2   :  { %3072 = vmatprep.subr.bf16.mxu0 %v3955_v15  ;;  %3104 = vmatprep.subr.bf16.mxu1 %v3957_v19  ;;  %v4004_v1 = vpack.c.bf16 %v1425_v13, %v1421_v7 }
 0x3d5   :  { %3074 = vmatpush1.bf16.msra.mxu0 %v3960_v38  ;;  %3106 = vmatpush1.bf16.msra.mxu1 %v3964_v30 }
 0x3d6   :  { %3076 = vmatprep.subr.bf16.mxu0 %v3966_v21  ;;  %3108 = vmatprep.subr.bf16.mxu1 %v3968_v37 }
 0x3d9   :  { %3078 = vmatpush1.bf16.msra.mxu0 %v3971_v44  ;;  %3110 = vmatpush1.bf16.msra.mxu1 %v3975_v55 }
 0x3da   :  { %3080 = vmatprep.subr.bf16.mxu0 %v3977_v61  ;;  %3112 = vmatprep.subr.bf16.mxu1 %v3980_v10 }
 0x3dd   :  { %3082 = vmatpush1.bf16.msra.mxu0 %v3983_v28  ;;  %3114 = vmatpush1.bf16.msra.mxu1 %v3987_v34 }
 0x3de   :  { %3084 = vmatprep.subr.bf16.mxu0 %v3989_v35  ;;  %3116 = vmatprep.subr.bf16.mxu1 %v3992_v52 }
 0x3e1   :  { %3086 = vmatpush1.bf16.msra.mxu0 %v3995_v17  ;;  %3118 = vmatpush1.bf16.msra.mxu1 %v3999_v18 }
 0x3e2   :  { %3088 = vmatprep.subr.bf16.mxu0 %v4001_v46  ;;  %3120 = vmatprep.subr.bf16.mxu1 %v4004_v1 }
 0x3e5   :  { %3090 = vmatpush1.bf16.msra.mxu0 %v4007_v25  ;;  %3122 = vmatpush1.bf16.msra.mxu1 %v4011_v26 }
 0x3e6   :  { %3092 = vmatprep.subr.bf16.mxu0 %v4013_v27  ;;  %3124 = vmatprep.subr.bf16.mxu1 %v4016_v32 }
 0x3e9   :  { %3094 = vmatpush1.bf16.msra.mxu0 %v4019_v50  ;;  %3126 = vmatpush1.bf16.msra.mxu1 %v4023_v51 }
 0x3ea   :  { %3096 = vmatprep.subr.bf16.mxu0 %v4025_v62  ;;  %3128 = vmatprep.subr.bf16.mxu1 %v4028_v11 }
 0x3ed   :  { %3098 = vmatpush1.bf16.msra.mxu0 %v4031_v22  ;;  %3130 = vmatpush1.bf16.msra.mxu1 %v4035_v23 }
 0x3ee   :  { %3132 = vmatprep.subr.bf16.mxu0 %v3944_v45  ;;  %3164 = vmatprep.subr.bf16.mxu1 %v3946_v56 }
 0x4a2   :  { %v1248_v24 = vpop.f32.mrb[8].mxu0  ;;  %v1319_v36 = vpop.f32.mrb[8].mxu1 }
 0x4a3   :  { %v1250_v41 = vpop.f32.mrb[9].mxu0  ;;  %v1321_v48 = vpop.f32.mrb[9].mxu1 }
 0x4a4   :  { %v1328_v58 = vcombine.low %v1248_v24, %v1250_v41  ;;  %v1329_v5 = vcombine.low %v1319_v36, %v1321_v48 }
 0x4a6   :  { %v1336_v6 = vrot.slane %v1328_v58, %v3854_v60  ;;  %v1343_v7 = vrot.slane %v1329_v5, %v3854_v60 }
 0x4a8   :  { %v1344_v13 = vcombine.low %v1336_v6, %v1343_v7  ;;  %v1377_v7 = vld [vmem:[#allocation4 + $0x4] ss:$8 sm:$0xf] }
 0x4aa   :  { %v1351_v47 = vrot.slane %v1344_v13, %v3854_v60 }
 0x4ac   :  { %v1353_v59 = vadd.f32 %v1351_v47, %v1117_v54 }
 0x4ae   :  { %v2631_v2 = vmul.f32 -1.442695, %v1353_v59 }
 0x4b0   :  { %3403 = vpow2.f32 %v2631_v2 }
 0x4ba   :  { %v3404_v8 = vpop.eup %3403 }
 0x4bb   :  { %v1357_v9 = vadd.f32 1.0, %v3404_v8 }
 0x4bd   :  { %3405 = vrcp.f32 %v1357_v9 }
 0x4c7   :  { %v3406_v14 = vpop.eup %3405 }
 0x4c8   :  { %v1361_v20 = vrot.slane %v3406_v14, 2  ;;  %v1365_v29 = vrot.slane %v3406_v14, 1  ;;  %v1371_v43 = vrot.slane %v3406_v14, 3 }
 0x4ca   :  { %v1363_v42 = vmul.f32 2.0, %v1361_v20  ;;  %v1367_v33 = vmul.f32 %v1365_v29, %v3939_v53 }
 0x4cc   :  { %v2632_v31 = vadd.f32 -1.0, %v1363_v42 }
 0x4ce   :  { %v1368_v39 = vmul.f32 %v3406_v14, %v2632_v31 }
 0x4d0   :  { %v4046_v40 = vadd.f32 %v1368_v39, %v1367_v33 }
 0x4d2   :  { %3407 = vtanh.f32 %v4046_v40 }
 0x4dc   :  { %v3408_v49 = vpop.eup %3407 }
 0x4dd   :  { %v1373_v63 = vmul.f32 %v3408_v49, %v1371_v43 }
 0x4df   :  { %v1374_v4 = vmax.f32 %v1373_v63, 0.0  ;;  %1507 = vmatmul.mubr.f32.vlgmr.msra.gmra.mrb[10].mxu0 %v1373_v63  ;;  %1578 = vmatmul.mubr.f32.vlgmr.msra.gmra.mrb[10].mxu1 %v1373_v63 }
 0x4e0   :  { %3134 = vmatpush1.bf16.msra.mxu0 %v3948_v57  ;;  %3166 = vmatpush1.bf16.msra.mxu1 %v3951_v3 }
 0x4e1   :  { %1375 = vst [vmem:[#allocation5 + $0x3] sm:$0x1] %v1374_v4  ;;  %3136 = vmatprep.subr.bf16.mxu0 %v3955_v15  ;;  %3168 = vmatprep.subr.bf16.mxu1 %v3957_v19 }
 0x4e2   :  { %1766 = vmatprep.mubr.f32.mxu0 %v3584_v0  ;;  %1837 = vmatprep.mubr.f32.mxu1 %v3584_v0 }
 0x4e4   :  { %3138 = vmatpush1.bf16.msra.mxu0 %v3960_v38  ;;  %3170 = vmatpush1.bf16.msra.mxu1 %v3964_v30 }
 0x4e5   :  { %3140 = vmatprep.subr.bf16.mxu0 %v3966_v21  ;;  %3172 = vmatprep.subr.bf16.mxu1 %v3968_v37 }
 0x4e8   :  { %3142 = vmatpush1.bf16.msra.mxu0 %v3971_v44  ;;  %3174 = vmatpush1.bf16.msra.mxu1 %v3975_v55 }
 0x4e9   :  { %3144 = vmatprep.subr.bf16.mxu0 %v3977_v61  ;;  %3176 = vmatprep.subr.bf16.mxu1 %v3980_v10 }
 0x4ec   :  { %3146 = vmatpush1.bf16.msra.mxu0 %v3983_v28  ;;  %3178 = vmatpush1.bf16.msra.mxu1 %v3987_v34 }
 0x4ed   :  { %3148 = vmatprep.subr.bf16.mxu0 %v3989_v35  ;;  %3180 = vmatprep.subr.bf16.mxu1 %v3992_v52 }
 0x4f0   :  { %3150 = vmatpush1.bf16.msra.mxu0 %v3995_v17  ;;  %3182 = vmatpush1.bf16.msra.mxu1 %v3999_v18 }
 0x4f1   :  { %3152 = vmatprep.subr.bf16.mxu0 %v4001_v46  ;;  %3184 = vmatprep.subr.bf16.mxu1 %v4004_v1 }
 0x4f4   :  { %3154 = vmatpush1.bf16.msra.mxu0 %v4007_v25  ;;  %3186 = vmatpush1.bf16.msra.mxu1 %v4011_v26 }
 0x4f5   :  { %3156 = vmatprep.subr.bf16.mxu0 %v4013_v27  ;;  %3188 = vmatprep.subr.bf16.mxu1 %v4016_v32 }
 0x4f8   :  { %3158 = vmatpush1.bf16.msra.mxu0 %v4019_v50  ;;  %3190 = vmatpush1.bf16.msra.mxu1 %v4023_v51 }
 0x4f9   :  { %3160 = vmatprep.subr.bf16.mxu0 %v4025_v62  ;;  %3192 = vmatprep.subr.bf16.mxu1 %v4028_v11 }
 0x4fc   :  { %3162 = vmatpush1.bf16.msra.mxu0 %v4031_v22  ;;  %3194 = vmatpush1.bf16.msra.mxu1 %v4035_v23 }
 0x4fd   :  { %3196 = vmatprep.subr.bf16.mxu0 %v3944_v45  ;;  %3228 = vmatprep.subr.bf16.mxu1 %v3946_v56 }
 0x5b2   :  { %v1508_v53 = vpop.f32.mrb[10].mxu0  ;;  %v1579_v12 = vpop.f32.mrb[10].mxu1 }
 0x5b3   :  { %v1510_v16 = vpop.f32.mrb[11].mxu0  ;;  %v1581_v24 = vpop.f32.mrb[11].mxu1 }
 0x5b4   :  { %v1588_v36 = vcombine.low %v1508_v53, %v1510_v16  ;;  %v1589_v41 = vcombine.low %v1579_v12, %v1581_v24 }
 0x5b6   :  { %v1596_v48 = vrot.slane %v1588_v36, %v3854_v60  ;;  %v1603_v58 = vrot.slane %v1589_v41, %v3854_v60 }
 0x5b8   :  { %v1604_v5 = vcombine.low %v1596_v48, %v1603_v58  ;;  %v1637_v58 = vld [vmem:[#allocation4 + $0x5] ss:$8 sm:$0xf] }
 0x5ba   :  { %v1611_v6 = vrot.slane %v1604_v5, %v3854_v60 }
 0x5bc   :  { %v1613_v13 = vadd.f32 %v1611_v6, %v1377_v7 }
 0x5be   :  { %v2633_v47 = vmul.f32 -1.442695, %v1613_v13 }
 0x5c0   :  { %3409 = vpow2.f32 %v2633_v47 }
 0x5ca   :  { %v3410_v54 = vpop.eup %3409 }
 0x5cb   :  { %v1617_v59 = vadd.f32 1.0, %v3410_v54 }
 0x5cd   :  { %3411 = vrcp.f32 %v1617_v59 }
 0x5d7   :  { %v3412_v2 = vpop.eup %3411 }
 0x5d8   :  { %v1621_v8 = vrot.slane %v3412_v2, 2  ;;  %v1625_v14 = vrot.slane %v3412_v2, 1  ;;  %v1631_v33 = vrot.slane %v3412_v2, 3 }
 0x5da   :  { %v1623_v9 = vmul.f32 2.0, %v1621_v8  ;;  %v1627_v42 = vmul.f32 %v1625_v14, %v4046_v40 }
 0x5dc   :  { %v2634_v20 = vadd.f32 -1.0, %v1623_v9 }
 0x5de   :  { %v1628_v29 = vmul.f32 %v3412_v2, %v2634_v20 }
 0x5e0   :  { %v4087_v31 = vadd.f32 %v1628_v29, %v1627_v42 }
 0x5e2   :  { %3413 = vtanh.f32 %v4087_v31 }
 0x5ec   :  { %v3414_v39 = vpop.eup %3413 }
 0x5ed   :  { %v1633_v43 = vmul.f32 %v3414_v39, %v1631_v33  ;;  %v2422_v39 = vld [vmem:[#allocation12 + $0x18] sm:$0xff] }
 0x5ef   :  { %v1634_v49 = vmax.f32 %v1633_v43, 0.0  ;;  %1767 = vmatmul.mubr.f32.vlgmr.msra.gmra.mrb[12].mxu0 %v1633_v43  ;;  %1838 = vmatmul.mubr.f32.vlgmr.msra.gmra.mrb[12].mxu1 %v1633_v43 }
 0x5f0   :  { %3198 = vmatpush1.bf16.msra.mxu0 %v3948_v57  ;;  %3230 = vmatpush1.bf16.msra.mxu1 %v3951_v3 }
 0x5f1   :  { %1635 = vst [vmem:[#allocation5 + $0x4] sm:$0x1] %v1634_v49  ;;  %3200 = vmatprep.subr.bf16.mxu0 %v3955_v15  ;;  %3232 = vmatprep.subr.bf16.mxu1 %v3957_v19  ;;  %v2423_v49 = vld [vmem:[#allocation12 + $0x20] sm:$0xff] }
 0x5f2   :  { %2026 = vmatprep.mubr.f32.mxu0 %v3584_v0  ;;  %2097 = vmatprep.mubr.f32.mxu1 %v3584_v0 }
 0x5f4   :  { %3202 = vmatpush1.bf16.msra.mxu0 %v3960_v38  ;;  %3234 = vmatpush1.bf16.msra.mxu1 %v3964_v30 }
 0x5f5   :  { %3204 = vmatprep.subr.bf16.mxu0 %v3966_v21  ;;  %3236 = vmatprep.subr.bf16.mxu1 %v3968_v37 }
 0x5f8   :  { %3206 = vmatpush1.bf16.msra.mxu0 %v3971_v44  ;;  %3238 = vmatpush1.bf16.msra.mxu1 %v3975_v55 }
 0x5f9   :  { %3208 = vmatprep.subr.bf16.mxu0 %v3977_v61  ;;  %3240 = vmatprep.subr.bf16.mxu1 %v3980_v10 }
 0x5fc   :  { %3210 = vmatpush1.bf16.msra.mxu0 %v3983_v28  ;;  %3242 = vmatpush1.bf16.msra.mxu1 %v3987_v34 }
 0x5fd   :  { %3212 = vmatprep.subr.bf16.mxu0 %v3989_v35  ;;  %3244 = vmatprep.subr.bf16.mxu1 %v3992_v52 }
 0x600   :  { %3214 = vmatpush1.bf16.msra.mxu0 %v3995_v17  ;;  %3246 = vmatpush1.bf16.msra.mxu1 %v3999_v18 }
 0x601   :  { %3216 = vmatprep.subr.bf16.mxu0 %v4001_v46  ;;  %3248 = vmatprep.subr.bf16.mxu1 %v4004_v1 }
 0x604   :  { %3218 = vmatpush1.bf16.msra.mxu0 %v4007_v25  ;;  %3250 = vmatpush1.bf16.msra.mxu1 %v4011_v26 }
 0x605   :  { %3220 = vmatprep.subr.bf16.mxu0 %v4013_v27  ;;  %3252 = vmatprep.subr.bf16.mxu1 %v4016_v32 }
 0x608   :  { %3222 = vmatpush1.bf16.msra.mxu0 %v4019_v50  ;;  %3254 = vmatpush1.bf16.msra.mxu1 %v4023_v51 }
 0x609   :  { %3224 = vmatprep.subr.bf16.mxu0 %v4025_v62  ;;  %3256 = vmatprep.subr.bf16.mxu1 %v4028_v11 }
 0x60c   :  { %3226 = vmatpush1.bf16.msra.mxu0 %v4031_v22  ;;  %3258 = vmatpush1.bf16.msra.mxu1 %v4035_v23 }
 0x60d   :  { %3260 = vmatprep.subr.bf16.mxu0 %v3944_v45  ;;  %3292 = vmatprep.subr.bf16.mxu1 %v3946_v56 }
 0x6c2   :  { %v1768_v40 = vpop.f32.mrb[12].mxu0  ;;  %v1839_v63 = vpop.f32.mrb[12].mxu1 }
 0x6c3   :  { %v1770_v4 = vpop.f32.mrb[13].mxu0  ;;  %v1841_v53 = vpop.f32.mrb[13].mxu1 }
 0x6c4   :  { %v1848_v12 = vcombine.low %v1768_v40, %v1770_v4  ;;  %v1849_v16 = vcombine.low %v1839_v63, %v1841_v53  ;;  %v2424_v40 = vld [vmem:[#allocation12 + $0x28] sm:$0xff]  ;;  %v2425_v4 = vld [vmem:[#allocation12 + $0x30] sm:$0xff]  ;;  %v2426_v53 = vld [vmem:[#allocation12 + $0x38] sm:$0xff] }
 0x6c5   :  { %v3330_v63 = vpack.c.bf16 %v2424_v40, %v2423_v49 }
 0x6c6   :  { %v1856_v24 = vrot.slane %v1848_v12, %v3854_v60  ;;  %v1863_v36 = vrot.slane %v1849_v16, %v3854_v60  ;;  %v3333_v12 = vpack.c.bf16 %v2426_v53, %v2425_v4  ;;  %v2427_v16 = vld [vmem:[#allocation12 + $0x40] sm:$0xff]  ;;  %v2527_v53 = vld [vmem:[#allocation14 + $0x70] sm:$0xff] }
 0x6c8   :  { %v1864_v41 = vcombine.low %v1856_v24, %v1863_v36  ;;  %v2428_v24 = vld [vmem:[#allocation12 + $0x48] sm:$0xff]  ;;  %v2429_v36 = vld [vmem:[#allocation12 + $0x50] sm:$0xff] }
 0x6ca   :  { %v1871_v48 = vrot.slane %v1864_v41, %v3854_v60  ;;  %v2430_v41 = vld [vmem:[#allocation12 + $0x58] sm:$0xff] }
 0x6cc   :  { %v1873_v5 = vadd.f32 %v1871_v48, %v1637_v58  ;;  %v3339_v48 = vpack.c.bf16 %v2430_v41, %v2429_v36  ;;  %v2431_v58 = vld [vmem:[#allocation12 + $0x60] sm:$0xff] }
 0x6ce   :  { %v2635_v6 = vmul.f32 -1.442695, %v1873_v5  ;;  %v2432_v5 = vld [vmem:[#allocation12 + $0x68] sm:$0xff] }
 0x6d0   :  { %3415 = vpow2.f32 %v2635_v6  ;;  %v3342_v6 = vpack.c.bf16 %v2432_v5, %v2431_v58 }
 0x6da   :  { %v3416_v45 = vpop.eup %3415 }
 0x6db   :  { %v1877_v7 = vadd.f32 1.0, %v3416_v45  ;;  %v2433_v45 = vld [vmem:[#allocation12 + $0x70] sm:$0xff] }
 0x6dd   :  { %3417 = vrcp.f32 %v1877_v7  ;;  %v2434_v7 = vld [vmem:[#allocation12 + $0x78] sm:$0xff] }
 0x6e7   :  { %v3418_v56 = vpop.eup %3417 }
 0x6e8   :  { %v1881_v13 = vrot.slane %v3418_v56, 2  ;;  %v1885_v54 = vrot.slane %v3418_v56, 1  ;;  %v1891_v14 = vrot.slane %v3418_v56, 3 }
 0x6ea   :  { %v1883_v47 = vmul.f32 2.0, %v1881_v13  ;;  %v1887_v2 = vmul.f32 %v1885_v54, %v4087_v31  ;;  %v3586_v31 = vmov 0.0|0.0   ;;  %v2513_v13 = vld [vmem:[#allocation14] sm:$0xff]  ;;  %v2515_v54 = vld [vmem:[#allocation14 + $0x10] sm:$0xff] }
 0x6ec   :  { %v2636_v59 = vadd.f32 -1.0, %v1883_v47  ;;  %v2514_v47 = vld [vmem:[#allocation14 + $0x8] sm:$0xff] }
 0x6ee   :  { %v1888_v8 = vmul.f32 %v3418_v56, %v2636_v59  ;;  %v3345_v56 = vpack.c.bf16 %v2434_v7, %v2433_v45  ;;  %v3348_v59 = vpack.c.bf16 %v2514_v47, %v2513_v13 }
 0x6f0   :  { %v4128_v9 = vadd.f32 %v1888_v8, %v1887_v2  ;;  %v2516_v2 = vld [vmem:[#allocation14 + $0x18] sm:$0xff] }
 0x6f1   :  { %v3351_v8 = vpack.c.bf16 %v2516_v2, %v2515_v54 }
 0x6f2   :  { %3419 = vtanh.f32 %v4128_v9 }
 0x6fc   :  { %v3420_v20 = vpop.eup %3419 }
 0x6fd   :  { %v1893_v42 = vmul.f32 %v3420_v20, %v1891_v14  ;;  %v2518_v14 = vld [vmem:[#allocation14 + $0x28] sm:$0xff] }
 0x6ff   :  { %v1894_v29 = vmax.f32 %v1893_v42, 0.0  ;;  %2027 = vmatmul.mubr.f32.vlgmr.msra.gmra.mrb[14].mxu0 %v1893_v42  ;;  %2098 = vmatmul.mubr.f32.vlgmr.msra.gmra.mrb[14].mxu1 %v1893_v42  ;;  %v2519_v42 = vld [vmem:[#allocation14 + $0x30] sm:$0xff] }
 0x700   :  { %3262 = vmatpush1.bf16.msra.mxu0 %v3948_v57  ;;  %3294 = vmatpush1.bf16.msra.mxu1 %v3951_v3 }
 0x701   :  { %1895 = vst [vmem:[#allocation5 + $0x5] sm:$0x1] %v1894_v29  ;;  %3264 = vmatprep.subr.bf16.mxu0 %v3955_v15  ;;  %3296 = vmatprep.subr.bf16.mxu1 %v3957_v19  ;;  %v2520_v29 = vld [vmem:[#allocation14 + $0x38] sm:$0xff] }
 0x702   :  { %2286 = vmatprep.mubr.f32.mxu0 %v3584_v0  ;;  %2357 = vmatprep.mubr.f32.mxu1 %v3584_v0 }
 0x704   :  { %3266 = vmatpush1.bf16.msra.mxu0 %v3960_v38  ;;  %3298 = vmatpush1.bf16.msra.mxu1 %v3964_v30 }
 0x705   :  { %3268 = vmatprep.subr.bf16.mxu0 %v3966_v21  ;;  %3300 = vmatprep.subr.bf16.mxu1 %v3968_v37 }
 0x708   :  { %3270 = vmatpush1.bf16.msra.mxu0 %v3971_v44  ;;  %3302 = vmatpush1.bf16.msra.mxu1 %v3975_v55 }
 0x709   :  { %3272 = vmatprep.subr.bf16.mxu0 %v3977_v61  ;;  %3304 = vmatprep.subr.bf16.mxu1 %v3980_v10  ;;  %v1897_v61 = vld [vmem:[#allocation4 + $0x6] ss:$8 sm:$0xf] }
 0x70c   :  { %3274 = vmatpush1.bf16.msra.mxu0 %v3983_v28  ;;  %3306 = vmatpush1.bf16.msra.mxu1 %v3987_v34 }
 0x70d   :  { %3276 = vmatprep.subr.bf16.mxu0 %v3989_v35  ;;  %3308 = vmatprep.subr.bf16.mxu1 %v3992_v52 }
 0x710   :  { %3278 = vmatpush1.bf16.msra.mxu0 %v3995_v17  ;;  %3310 = vmatpush1.bf16.msra.mxu1 %v3999_v18 }
 0x711   :  { %3280 = vmatprep.subr.bf16.mxu0 %v4001_v46  ;;  %3312 = vmatprep.subr.bf16.mxu1 %v4004_v1 }
 0x714   :  { %3282 = vmatpush1.bf16.msra.mxu0 %v4007_v25  ;;  %3314 = vmatpush1.bf16.msra.mxu1 %v4011_v26 }
 0x715   :  { %3284 = vmatprep.subr.bf16.mxu0 %v4013_v27  ;;  %3316 = vmatprep.subr.bf16.mxu1 %v4016_v32 }
 0x718   :  { %3286 = vmatpush1.bf16.msra.mxu0 %v4019_v50  ;;  %3318 = vmatpush1.bf16.msra.mxu1 %v4023_v51 }
 0x719   :  { %3288 = vmatprep.subr.bf16.mxu0 %v4025_v62  ;;  %3320 = vmatprep.subr.bf16.mxu1 %v4028_v11  ;;  %v2419_v11 = vld [vmem:[#allocation12] sm:$0xff] }
 0x71c   :  { %3290 = vmatpush1.bf16.msra.mxu0 %v4031_v22  ;;  %3322 = vmatpush1.bf16.msra.mxu1 %v4035_v23  ;;  %v2420_v22 = vld [vmem:[#allocation12 + $0x8] sm:$0xff]  ;;  %v2421_v23 = vld [vmem:[#allocation12 + $0x10] sm:$0xff] }
 0x71d   :  { %3323 = vmatprep.subr.bf16.mxu0 %v3586_v31  ;;  %v3324_v33 = vpack.c.bf16 %v2420_v22, %v2419_v11  ;;  %3347 = vmatprep.subr.bf16.mxu1 %v3586_v31  ;;  %v3327_v43 = vpack.c.bf16 %v2422_v39, %v2421_v23 }
 0x7d2   :  { %v2028_v57 = vpop.f32.mrb[14].mxu0  ;;  %v2099_v3 = vpop.f32.mrb[14].mxu1 }
 0x7d3   :  { %v2030_v15 = vpop.f32.mrb[15].mxu0  ;;  %v2101_v19 = vpop.f32.mrb[15].mxu1 }
 0x7d4   :  { %v2108_v38 = vcombine.low %v2028_v57, %v2030_v15  ;;  %v2109_v30 = vcombine.low %v2099_v3, %v2101_v19  ;;  %v3357_v57 = vpack.c.bf16 %v2520_v29, %v2519_v42  ;;  %v2521_v3 = vld [vmem:[#allocation14 + $0x40] sm:$0xff]  ;;  %v2522_v15 = vld [vmem:[#allocation14 + $0x48] sm:$0xff] }
 0x7d5   :  { %v3360_v19 = vpack.c.bf16 %v2522_v15, %v2521_v3 }
 0x7d6   :  { %v2116_v21 = vrot.slane %v2108_v38, %v3854_v60  ;;  %v2123_v37 = vrot.slane %v2109_v30, %v3854_v60  ;;  %v2523_v38 = vld [vmem:[#allocation14 + $0x50] sm:$0xff]  ;;  %v2524_v30 = vld [vmem:[#allocation14 + $0x58] sm:$0xff] }
 0x7d8   :  { %v2124_v44 = vcombine.low %v2116_v21, %v2123_v37  ;;  %v3363_v21 = vpack.c.bf16 %v2524_v30, %v2523_v38  ;;  %v2525_v37 = vld [vmem:[#allocation14 + $0x60] sm:$0xff] }
 0x7da   :  { %v2131_v55 = vrot.slane %v2124_v44, %v3854_v60  ;;  %v2526_v44 = vld [vmem:[#allocation14 + $0x68] sm:$0xff] }
 0x7dc   :  { %v2133_v10 = vadd.f32 %v2131_v55, %v1897_v61  ;;  %v3366_v55 = vpack.c.bf16 %v2526_v44, %v2525_v37 }
 0x7de   :  { %v2637_v28 = vmul.f32 -1.442695, %v2133_v10 }
 0x7e0   :  { %3421 = vpow2.f32 %v2637_v28 }
 0x7ea   :  { %v3422_v34 = vpop.eup %3421 }
 0x7eb   :  { %v2137_v35 = vadd.f32 1.0, %v3422_v34 }
 0x7ed   :  { %3423 = vrcp.f32 %v2137_v35 }
 0x7f7   :  { %v3424_v52 = vpop.eup %3423 }
 0x7f8   :  { %v2141_v17 = vrot.slane %v3424_v52, 2  ;;  %v2145_v46 = vrot.slane %v3424_v52, 1  ;;  %v2151_v32 = vrot.slane %v3424_v52, 3 }
 0x7fa   :  { %v2143_v18 = vmul.f32 2.0, %v2141_v17  ;;  %v2147_v25 = vmul.f32 %v2145_v46, %v4128_v9  ;;  %v2517_v9 = vld [vmem:[#allocation14 + $0x20] sm:$0xff] }
 0x7fb   :  { %v3354_v20 = vpack.c.bf16 %v2518_v14, %v2517_v9 }
 0x7fc   :  { %v2638_v1 = vadd.f32 -1.0, %v2143_v18 }
 0x7fe   :  { %v2148_v26 = vmul.f32 %v3424_v52, %v2638_v1 }
 0x800   :  { %v4167_v27 = vadd.f32 %v2148_v26, %v2147_v25  ;;  %v2157_v25 = vld [vmem:[#allocation4 + $0x7] ss:$8 sm:$0xf] }
 0x802   :  { %3425 = vtanh.f32 %v4167_v27 }
 0x80c   :  { %v3426_v50 = vpop.eup %3425 }
 0x80d   :  { %v2153_v51 = vmul.f32 %v3426_v50, %v2151_v32 }
 0x80f   :  { %v2154_v62 = vmax.f32 %v2153_v51, 0.0  ;;  %2287 = vmatmul.mubr.f32.vlgmr.msra.gmra.mrb[16].mxu0 %v2153_v51  ;;  %2358 = vmatmul.mubr.f32.vlgmr.msra.gmra.mrb[16].mxu1 %v2153_v51 }
 0x810   :  { %2709 = vmatprep.mubr.msk.f32.mxu0 %vm3587_vm0, %v3584_v0  ;;  %2744 = vmatprep.mubr.msk.f32.mxu1 %vm3587_vm0, %v3584_v0  ;;  %v3336_v0 = vpack.c.bf16 %v2428_v24, %v2427_v16 }
 0x811   :  { %2155 = vst [vmem:[#allocation5 + $0x6] sm:$0x1] %v2154_v62  ;;  %3325 = vmatpush3.bf16.msra.mxu0 %v3324_v33  ;;  %3349 = vmatpush3.bf16.msra.mxu1 %v3348_v59 }
 0x812   :  { %3326 = vmatprep.subr.bf16.mxu0 %v3586_v31  ;;  %3350 = vmatprep.subr.bf16.mxu1 %v3586_v31 }
 0x815   :  { %3328 = vmatpush3.bf16.msra.mxu0 %v3327_v43  ;;  %3352 = vmatpush3.bf16.msra.mxu1 %v3351_v8 }
 0x816   :  { %3329 = vmatprep.subr.bf16.mxu0 %v3586_v31  ;;  %3353 = vmatprep.subr.bf16.mxu1 %v3586_v31 }
 0x819   :  { %3331 = vmatpush3.bf16.msra.mxu0 %v3330_v63  ;;  %3355 = vmatpush3.bf16.msra.mxu1 %v3354_v20 }
 0x81a   :  { %3332 = vmatprep.subr.bf16.mxu0 %v3586_v31  ;;  %3356 = vmatprep.subr.bf16.mxu1 %v3586_v31 }
 0x81d   :  { %3334 = vmatpush3.bf16.msra.mxu0 %v3333_v12  ;;  %3358 = vmatpush3.bf16.msra.mxu1 %v3357_v57  ;;  %v2528_v12 = vld [vmem:[#allocation14 + $0x78] sm:$0xff] }
 0x81e   :  { %3335 = vmatprep.subr.bf16.mxu0 %v3586_v31  ;;  %3359 = vmatprep.subr.bf16.mxu1 %v3586_v31  ;;  %v3369_v16 = vpack.c.bf16 %v2528_v12, %v2527_v53 }
 0x821   :  { %3337 = vmatpush3.bf16.msra.mxu0 %v3336_v0  ;;  %3361 = vmatpush3.bf16.msra.mxu1 %v3360_v19 }
 0x822   :  { %3338 = vmatprep.subr.bf16.mxu0 %v3586_v31  ;;  %3362 = vmatprep.subr.bf16.mxu1 %v3586_v31 }
 0x825   :  { %3340 = vmatpush3.bf16.msra.mxu0 %v3339_v48  ;;  %3364 = vmatpush3.bf16.msra.mxu1 %v3363_v21  ;;  %v2642_v48 = vld [vmem:[%s4217_s7] ss:$0 sm:$0xff] }
 0x826   :  { %3341 = vmatprep.subr.bf16.mxu0 %v3586_v31  ;;  %3365 = vmatprep.subr.bf16.mxu1 %v3586_v31 }
 0x829   :  { %3343 = vmatpush3.bf16.msra.mxu0 %v3342_v6  ;;  %3367 = vmatpush3.bf16.msra.mxu1 %v3366_v55 }
 0x82a   :  { %3344 = vmatprep.subr.bf16.mxu0 %v3586_v31  ;;  %3368 = vmatprep.subr.bf16.mxu1 %v3586_v31 }
 0x82d   :  { %3346 = vmatpush3.bf16.msra.mxu0 %v3345_v56  ;;  %3370 = vmatpush3.bf16.msra.mxu1 %v3369_v16 }
 0x8e2   :  { %v2288_v61 = vpop.f32.mrb[16].mxu0  ;;  %v2359_v10 = vpop.f32.mrb[16].mxu1 }
 0x8e3   :  { %v2290_v28 = vpop.f32.mrb[17].mxu0  ;;  %v2361_v34 = vpop.f32.mrb[17].mxu1 }
 0x8e4   :  { %v2368_v35 = vcombine.low %v2288_v61, %v2290_v28  ;;  %v2369_v52 = vcombine.low %v2359_v10, %v2361_v34 }
 0x8e6   :  { %v2376_v17 = vrot.slane %v2368_v35, %v3854_v60  ;;  %v2383_v18 = vrot.slane %v2369_v52, %v3854_v60 }
 0x8e8   :  { %v2384_v46 = vcombine.low %v2376_v17, %v2383_v18 }
 0x8ea   :  { %v2391_v1 = vrot.slane %v2384_v46, %v3854_v60 }
 0x8ec   :  { %v2393_v26 = vadd.f32 %v2391_v1, %v2157_v25 }
 0x8ee   :  { %v2639_v32 = vmul.f32 -1.442695, %v2393_v26 }
 0x8f0   :  { %3427 = vpow2.f32 %v2639_v32 }
 0x8fa   :  { %v3428_v50 = vpop.eup %3427 }
 0x8fb   :  { %v2397_v51 = vadd.f32 1.0, %v3428_v50 }
 0x8fd   :  { %3429 = vrcp.f32 %v2397_v51 }
 0x907   :  { %v3430_v62 = vpop.eup %3429 }
 0x908   :  { %v2401_v11 = vrot.slane %v3430_v62, 2  ;;  %v2405_v23 = vrot.slane %v3430_v62, 1  ;;  %v2411_v49 = vrot.slane %v3430_v62, 3 }
 0x90a   :  { %v2403_v22 = vmul.f32 2.0, %v2401_v11  ;;  %v2407_v33 = vmul.f32 %v2405_v23, %v4167_v27  ;;  %v2641_v27 = vld [vmem:[%s4215_s5] ss:$0 sm:$0xff] }
 0x90c   :  { %v2640_v31 = vadd.f32 -1.0, %v2403_v22 }
 0x90e   :  { %v2408_v39 = vmul.f32 %v3430_v62, %v2640_v31 }
 0x910   :  { %v2409_v43 = vadd.f32 %v2408_v39, %v2407_v33 }
 0x912   :  { %3431 = vtanh.f32 %v2409_v43  ;;  %2417 = vst [vmem:[#allocation3] sm:$0x1] %v2409_v43 }
 0x91c   :  { %v3432_v60 = vpop.eup %3431 }
 0x91d   :  { %v2413_v40 = vmul.f32 %v3432_v60, %v2411_v49 }
 0x91f   :  { %v2414_v63 = vmax.f32 %v2413_v40, 0.0  ;;  %2416 = vst [vmem:[#allocation2] sm:$0x1] %v2413_v40 }
 0x921   :  { %2415 = vst [vmem:[#allocation5 + $0x7] sm:$0x1] %v2414_v63 }
 0x928   :  { %v2418_v4 = vld [vmem:[#allocation5] sm:$0xff] }
 0x929   :  { %2710 = vmatmul.mubr.f32.vlgmr.msra.gmra.mrb[18].mxu0 %v2418_v4 }
 0x9fc   :  { %v2508_v24 = vpop.f32.mrb[18].mxu0 }
 0x9fd   :  { %v2509_v0 = vadd.f32 %v2641_v27, %v2508_v24  ;;  %v2711_v36 = vpop.f32.mrb[19].mxu0 }
 0x9ff   :  { %v2512_v41 = vmax.f32 %v2509_v0, 0.0 }
 0xa01   :  { %2745 = vmatmul.mubr.f32.vlgmr.msra.gmra.mrb[18].mxu1 %v2512_v41 }
 0xad4   :  { %v2602_v58 = vpop.f32.mrb[18].mxu1 }
 0xad5   :  { %v2603_v5 = vadd.f32 %v2642_v48, %v2602_v58  ;;  %v2746_v6 = vpop.f32.mrb[19].mxu1 }
 0xad7   :  { %3433 = vtanh.f32 %v2603_v5 }
 0xae1   :  { %v3434_v45 = vpop.eup %3433 }
 0xae2   :  { %2607 = vst [vmem:[#allocation15] sm:$0xff] %v3434_v45 }
 0xae3   :  { %3556 = shalt.err (!%p3553_p2)
}
 0xae4   :  { %s3557_s7 = scalar_lea.hbm %s4218_s8, 128 }
 0xae5   :  { %p3558_p3 = scmp.ne.s32.totalorder %s4218_s8, %s3557_s7  ;;  %p3561_p4 = scmp.lt.u32.totalorder %s3557_s7, %s4218_s8 }
 0xae7   :  { %p3563_p5 = pnand %p3561_p4, %p3558_p3 }
 0xae9   :  { %3566 = shalt.err (!%p3563_p5)
}
 0xaea   :  { %2617 = dma.vmem_to_hbm [thread:$0]  %s2615_s26, 128, %s4218_s8, [#allocation8]  }
 0xaeb   :  { %3573 = dma.done.wait [#allocation8], 128  }
 0xaec   :  { %3574 = vsyncadd [#allocation8], 4294967168 }
 0xaed   :  { %2621 = vsyncpa [#allocation7], 1 }
 0xaee   :  { %2622 = vsyncpa [#allocation10], 1 }
 0xaef   :  { %2623 = vsyncpa [#allocation13], 1 }
 0xaf0   :  { %2624 = vsyncpa [#allocation8], 1 }

</bundles_post_ra>
